<compile_context>
chip_gen: v7x
topology: tpu7x:2x2x1
jax: 0.10.0
libtpu: 0.0.40
codegen_flags: <defaults>
</compile_context>

<pallas_src>
import functools
import math

import jax
import jax.numpy as jnp
from jax import lax
from jax.experimental import pallas as pl
from jax.experimental.pallas import tpu as pltpu

INV_SQRT10 = 1.0 / math.sqrt(10.0)


def _round_up(n, m):
    return ((n + m - 1) // m) * m


# ----------------------------- fused kernel --------------------------------------

def _fused_resmlp_kernel(x_ref, in_w_ref, in_b_ref,
                         w1_ref, b1_ref, w2_ref, b2_ref, aff_ref,
                         out_w_ref, out_b_ref, out_aff_ref,
                         o_ref, *, ew_dtype):
    """One grid step = one batch tile; the layer sweep is an in-kernel loop.

    All ResBlock weights are resident in VMEM (constant index_map); the running
    activation h is carried as an f32 loop value (residual add + accumulation
    stay f32).  mm_dtype = MXU operand dtype, ew_dtype = affine/tanh dtype.
    """
    mm_dtype = w1_ref.dtype
    n_layer = w1_ref.shape[0]

    # ---- input Linear ----
    h = (jnp.dot(x_ref[...].astype(mm_dtype), in_w_ref[...],
                 preferred_element_type=jnp.float32)
         + in_b_ref[...])

    # ---- ResBlocks (in_size == out_size -> skip = Identity) ----
    # Original math:
    #   o1 = layer1(tanh(x*g1 + c1)) / sqrt(10)
    #   o2 = layer2(tanh(o1*g2 + c2)) / sqrt(10) + x
    # The 1/sqrt(10) factors are pre-folded into w1/b1/w2/b2 on the host.
    def layer_body(l, h):
        g1 = aff_ref[4 * l + 0].astype(ew_dtype)
        c1 = aff_ref[4 * l + 1].astype(ew_dtype)
        g2 = aff_ref[4 * l + 2].astype(ew_dtype)
        c2 = aff_ref[4 * l + 3].astype(ew_dtype)

        h1 = jnp.tanh(h.astype(ew_dtype) * g1 + c1).astype(mm_dtype)
        o1 = (jnp.dot(h1, w1_ref[l], preferred_element_type=jnp.float32)
              + b1_ref[l])
        h2 = jnp.tanh(o1.astype(ew_dtype) * g2 + c2).astype(mm_dtype)
        return (jnp.dot(h2, w2_ref[l], preferred_element_type=jnp.float32)
                + b2_ref[l] + h)                       # residual add in f32

    h = lax.fori_loop(0, n_layer, layer_body, h, unroll=(n_layer <= 8))

    # ---- head: Tanh -> Linear -> Affine ----
    y = (jnp.dot(jnp.tanh(h).astype(mm_dtype), out_w_ref[...],
                 preferred_element_type=jnp.float32)
         + out_b_ref[...])
    # TODO(synk): Dout < 128 lowers to masked partial stores; pad the output lane
    # dim to 128 (and slice in the wrapper) if the head ever becomes store-bound.
    o_ref[...] = y * out_aff_ref[0] + out_aff_ref[1]


# ----------------------------- wrappers -------------------------------------------

def prepare_fused_params(params, matmul_dtype=jnp.float32):
    """Stack per-block params, fold 1/sqrt(10) into each ResBlock Linear, cast
    MXU-operand weights, and flatten the affine scalars to 1-D (SMEM-friendly)."""
    blocks = params["blocks"]
    w1 = (jnp.stack([b[0] for b in blocks]) * INV_SQRT10).astype(matmul_dtype)  # (L,H,H)
    b1 = jnp.stack([b[1] for b in blocks]) * INV_SQRT10                         # (L,1,H) f32
    w2 = (jnp.stack([b[2] for b in blocks]) * INV_SQRT10).astype(matmul_dtype)
    b2 = jnp.stack([b[3] for b in blocks]) * INV_SQRT10
    aff = jnp.stack([b[4] for b in blocks]).reshape(-1).astype(jnp.float32)     # (4L,)
    return dict(
        in_w=params["in_w"].astype(matmul_dtype), in_b=params["in_b"],
        w1=w1, b1=b1, w2=w2, b2=b2, aff=aff,
        out_w=params["out_w"].astype(matmul_dtype), out_b=params["out_b"],
        out_aff=params["out_aff"].astype(jnp.float32),
    )


def resmlp_apply_fused(fused, x, *, batch_tile=128, elementwise_dtype=jnp.float32):
    B, Din = x.shape
    H = fused["in_w"].shape[1]
    Dout = fused["out_w"].shape[1]
    n_layer = fused["w1"].shape[0]
    assert n_layer >= 1

    # Batch tile: multiple of 8, default 128 so B >= 256 gives >= 2 parallel
    # tiles (both v7x TensorCores engaged).  Pad batch to a tile multiple.
    TB = min(batch_tile, _round_up(B, 8))
    assert TB % 8 == 0
    B_pad = _round_up(B, TB)
    x_p = x if B_pad == B else jnp.pad(x, ((0, B_pad - B), (0, 0)))
    grid = (B_pad // TB,)

    # ---- explicit scoped-VMEM budget (feedback: don't rely on the 16/32 MiB default) ----
    def _nbytes(a):
        return int(a.size) * int(a.dtype.itemsize)

    weight_bytes = sum(_nbytes(fused[k]) for k in
                       ("in_w", "in_b", "w1", "b1", "w2", "b2", "out_w", "out_b"))
    io_block_bytes = (TB * Din + TB * Dout) * 4          # x tile + out tile (f32)
    interm_bytes = 8 * TB * H * 4                        # h / h1 / o1 / h2 / head temps (f32)
    vmem_needed = 2 * (weight_bytes + io_block_bytes) + interm_bytes + (2 << 20)
    if vmem_needed > (56 << 20):
        # TODO(synk): for very large H, switch to a per-layer streaming grid axis
        # (bf16 weights, N-tiled matmuls) instead of keeping all weights resident.
        raise ValueError(
            f"resident-weight footprint {vmem_needed/2**20:.1f} MiB exceeds the "
            f"v7x-safe VMEM budget; use a smaller batch_tile / bf16 weights.")
    vmem_limit = int(min(64 << 20, max(32 << 20, vmem_needed)))

    kernel = functools.partial(_fused_resmlp_kernel, ew_dtype=elementwise_dtype)

    out = pl.pallas_call(
        kernel,
        out_shape=jax.ShapeDtypeStruct((B_pad, Dout), jnp.float32),
        grid=grid,
        in_specs=[
            pl.BlockSpec((TB, Din), lambda i: (i, 0)),              # x (tiled on batch)
            pl.BlockSpec((Din, H), lambda i: (0, 0)),               # in_w  (resident)
            pl.BlockSpec((1, H), lambda i: (0, 0)),                 # in_b
            pl.BlockSpec((n_layer, H, H), lambda i: (0, 0, 0)),     # w1 stack (pre-scaled)
            pl.BlockSpec((n_layer, 1, H), lambda i: (0, 0, 0)),     # b1 stack
            pl.BlockSpec((n_layer, H, H), lambda i: (0, 0, 0)),     # w2 stack (pre-scaled)
            pl.BlockSpec((n_layer, 1, H), lambda i: (0, 0, 0)),     # b2 stack
            pl.BlockSpec(memory_space=pltpu.MemorySpace.SMEM),      # aff (4L,) scalars
            pl.BlockSpec((H, Dout), lambda i: (0, 0)),              # out_w
            pl.BlockSpec((1, Dout), lambda i: (0, 0)),              # out_b
            pl.BlockSpec(memory_space=pltpu.MemorySpace.SMEM),      # out_aff (2,)
        ],
        out_specs=pl.BlockSpec((TB, Dout), lambda i: (i, 0)),
        compiler_params=pltpu.CompilerParams(
            dimension_semantics=("parallel",),
            vmem_limit_bytes=vmem_limit),
    )(x_p, fused["in_w"], fused["in_b"],
      fused["w1"], fused["b1"], fused["w2"], fused["b2"], fused["aff"],
      fused["out_w"], fused["out_b"], fused["out_aff"])

    return out[:B]


def resmlp_forward_pallas(params, x, *, matmul_dtype=jnp.float32,
                          elementwise_dtype=jnp.float32, batch_tile=128):
    fused = prepare_fused_params(params, matmul_dtype)
    return resmlp_apply_fused(fused, x, batch_tile=batch_tile,
                              elementwise_dtype=elementwise_dtype)


# ----------------------------- params & reference ---------------------------------

def init_resmlp_params(key, input_dim, output_dim, int_dim, n_layer):
    """Shapes mirror the PyTorch module (hidden = int_dim * 128).  Affine params
    are perturbed from the PyTorch init (gain=1, bias=0) so that path is exercised."""
    H = int_dim * 128

    def lin(k, din, dout):
        kw, kb = jax.random.split(k)
        w = jax.random.normal(kw, (din, dout), jnp.float32) / jnp.sqrt(jnp.float32(din))
        b = jax.random.normal(kb, (1, dout), jnp.float32) * 0.01
        return w, b

    def affine(k):
        kg, kb = jax.random.split(k)
        g = 1.0 + 0.1 * jax.random.normal(kg, (), jnp.float32)
        c = 0.1 * jax.random.normal(kb, (), jnp.float32)
        return g, c

    keys = jax.random.split(key, n_layer + 3)
    params = {}
    params["in_w"], params["in_b"] = lin(keys[0], input_dim, H)

    blocks = []
    for li in range(n_layer):
        k1, k2, ka1, ka2 = jax.random.split(keys[1 + li], 4)
        w1, b1 = lin(k1, H, H)
        w2, b2 = lin(k2, H, H)
        g1, c1 = affine(ka1)
        g2, c2 = affine(ka2)
        aff = jnp.stack([g1, c1, g2, c2]).astype(jnp.float32)  # [gain1,bias1,gain2,bias2]
        blocks.append((w1, b1, w2, b2, aff))
    params["blocks"] = blocks

    params["out_w"], params["out_b"] = lin(keys[n_layer + 1], H, output_dim)
    go, co = affine(keys[n_layer + 2])
    params["out_aff"] = jnp.stack([go, co]).astype(jnp.float32)
    return params


def resmlp_forward_ref(params, x):
    """Pure-JAX f32 reference, written exactly like the PyTorch forward."""
    h = x @ params["in_w"] + params["in_b"]
    for (w1, b1, w2, b2, aff) in params["blocks"]:
        g1, c1, g2, c2 = aff
        o1 = (jnp.tanh(h * g1 + c1) @ w1 + b1) * INV_SQRT10
        h = (jnp.tanh(o1 * g2 + c2) @ w2 + b2) * INV_SQRT10 + h
    y = jnp.tanh(h) @ params["out_w"] + params["out_b"]
    g, c = params["out_aff"]
    return y * g + c


# ----------------------------- main ------------------------------------------------

if __name__ == "__main__":
    key = jax.random.PRNGKey(0)
    k_param, k_x = jax.random.split(key)

    INPUT_DIM = 8
    OUTPUT_DIM = 4
    INT_DIM = 1          # hidden = 1 * 128 = 128
    N_LAYER = 3
    BATCH = 256          # batch_tile=128 -> grid=(2,): two parallel batch tiles

    params = init_resmlp_params(k_param, INPUT_DIM, OUTPUT_DIM, INT_DIM, N_LAYER)
    x = jax.random.normal(k_x, (BATCH, INPUT_DIM), jnp.float32)

    ref = resmlp_forward_ref(params, x)

    # f32 MXU-operand path (tolerance accounts for default TPU matmul precision
    # and the host-side 1/sqrt(10) weight folding vs. the reference order of ops).
    out = jax.block_until_ready(resmlp_forward_pallas(params, x))
    assert out.shape == (BATCH, OUTPUT_DIM)
    assert jnp.allclose(out, ref, rtol=1e-2, atol=1e-2), "f32 mismatch vs reference"

    # bf16-weight path (v5e/v6e/v7x fast path): bf16 MXU operands, f32
    # accumulation/elementwise (the v5e-safe config); looser tolerance.
    out_bf16 = jax.block_until_ready(
        resmlp_forward_pallas(params, x, matmul_dtype=jnp.bfloat16))
    assert out_bf16.shape == (BATCH, OUTPUT_DIM)
    assert jnp.allclose(out_bf16, ref, rtol=5e-2, atol=5e-2), "bf16 mismatch vs reference"

    print("KERNEL_OK")
</pallas_src>

<mosaic_0001>
module attributes {stable_mosaic.version = 11 : i64} {
  func.func @_fused_resmlp_kernel(%arg0: i32, %arg1: memref<128x8xf32, #tpu.memory_space<vmem>>, %arg2: memref<8x128xf32, #tpu.memory_space<vmem>>, %arg3: memref<1x128xf32, #tpu.memory_space<vmem>>, %arg4: memref<3x128x128xf32, #tpu.memory_space<vmem>>, %arg5: memref<3x1x128xf32, #tpu.memory_space<vmem>>, %arg6: memref<3x128x128xf32, #tpu.memory_space<vmem>>, %arg7: memref<3x1x128xf32, #tpu.memory_space<vmem>>, %arg8: memref<12xf32, #tpu.memory_space<smem>>, %arg9: memref<128x4xf32, #tpu.memory_space<vmem>>, %arg10: memref<1x4xf32, #tpu.memory_space<vmem>>, %arg11: memref<2xf32, #tpu.memory_space<smem>>, %arg12: memref<128x4xf32, #tpu.memory_space<vmem>>) attributes {dimension_semantics = [#tpu.dimension_semantics<parallel>], iteration_bounds = array<i64: 2>, scalar_prefetch = 0 : i64, scratch_operands = 0 : i64, tpu.core_type = #tpu.core_type<tc>, window_params = [{transform_indices = @transform_0, window_bounds = array<i64: 128, 8>}, {pipeline_mode = #tpu.pipeline_mode<synchronous>, transform_indices = @transform_1, window_bounds = array<i64: 8, 128>}, {pipeline_mode = #tpu.pipeline_mode<synchronous>, transform_indices = @transform_2, window_bounds = array<i64: 1, 128>}, {pipeline_mode = #tpu.pipeline_mode<synchronous>, transform_indices = @transform_3, window_bounds = array<i64: 3, 128, 128>}, {pipeline_mode = #tpu.pipeline_mode<synchronous>, transform_indices = @transform_4, window_bounds = array<i64: 3, 1, 128>}, {pipeline_mode = #tpu.pipeline_mode<synchronous>, transform_indices = @transform_5, window_bounds = array<i64: 3, 128, 128>}, {pipeline_mode = #tpu.pipeline_mode<synchronous>, transform_indices = @transform_6, window_bounds = array<i64: 3, 1, 128>}, {transform_indices = @transform_7, window_bounds = array<i64: 12>}, {pipeline_mode = #tpu.pipeline_mode<synchronous>, transform_indices = @transform_8, window_bounds = array<i64: 128, 4>}, {pipeline_mode = #tpu.pipeline_mode<synchronous>, transform_indices = @transform_9, window_bounds = array<i64: 1, 4>}, {transform_indices = @transform_10, window_bounds = array<i64: 2>}, {transform_indices = @transform_11, window_bounds = array<i64: 128, 4>}]} {
    %c0 = arith.constant 0 : index
    %c0_0 = arith.constant 0 : index
    %0 = vector.load %arg1[%c0, %c0_0] : memref<128x8xf32, #tpu.memory_space<vmem>>, vector<128x8xf32>
    %c0_1 = arith.constant 0 : index
    %c0_2 = arith.constant 0 : index
    %1 = vector.load %arg2[%c0_1, %c0_2] : memref<8x128xf32, #tpu.memory_space<vmem>>, vector<8x128xf32>
    %cst = arith.constant dense<0.000000e+00> : vector<128x128xf32>
    %2 = tpu.matmul %0, %1, %cst {dimension_numbers = #tpu.dot_dimension_numbers<[1], [0], [0], [1], [0, 0, 1, 1], [], []>} : vector<128x8xf32>, vector<8x128xf32>, vector<128x128xf32> -> vector<128x128xf32>
    %c0_3 = arith.constant 0 : index
    %c0_4 = arith.constant 0 : index
    %3 = vector.load %arg3[%c0_3, %c0_4] : memref<1x128xf32, #tpu.memory_space<vmem>>, vector<1x128xf32>
    %4 = vector.broadcast %3 : vector<1x128xf32> to vector<128x128xf32>
    %5 = arith.addf %2, %4 : vector<128x128xf32>
    %c0_i32 = arith.constant 0 : i32
    %c4_i32 = arith.constant 4 : i32
    %6 = arith.muli %c4_i32, %c0_i32 : i32
    %c0_i32_5 = arith.constant 0 : i32
    %7 = arith.addi %6, %c0_i32_5 : i32
    %8 = arith.index_cast %7 : i32 to index
    %9 = memref.load %arg8[%8] : memref<12xf32, #tpu.memory_space<smem>>
    %c4_i32_6 = arith.constant 4 : i32
    %10 = arith.muli %c4_i32_6, %c0_i32 : i32
    %c1_i32 = arith.constant 1 : i32
    %11 = arith.addi %10, %c1_i32 : i32
    %12 = arith.index_cast %11 : i32 to index
    %13 = memref.load %arg8[%12] : memref<12xf32, #tpu.memory_space<smem>>
    %c4_i32_7 = arith.constant 4 : i32
    %14 = arith.muli %c4_i32_7, %c0_i32 : i32
    %c2_i32 = arith.constant 2 : i32
    %15 = arith.addi %14, %c2_i32 : i32
    %16 = arith.index_cast %15 : i32 to index
    %17 = memref.load %arg8[%16] : memref<12xf32, #tpu.memory_space<smem>>
    %c4_i32_8 = arith.constant 4 : i32
    %18 = arith.muli %c4_i32_8, %c0_i32 : i32
    %c3_i32 = arith.constant 3 : i32
    %19 = arith.addi %18, %c3_i32 : i32
    %20 = arith.index_cast %19 : i32 to index
    %21 = memref.load %arg8[%20] : memref<12xf32, #tpu.memory_space<smem>>
    %22 = vector.broadcast %9 : f32 to vector<128x128xf32>
    %23 = arith.mulf %5, %22 : vector<128x128xf32>
    %24 = vector.broadcast %13 : f32 to vector<128x128xf32>
    %25 = arith.addf %23, %24 : vector<128x128xf32>
    %26 = math.tanh %25 : vector<128x128xf32>
    %27 = arith.index_cast %c0_i32 : i32 to index
    %c0_9 = arith.constant 0 : index
    %c0_10 = arith.constant 0 : index
    %28 = vector.load %arg4[%27, %c0_9, %c0_10] : memref<3x128x128xf32, #tpu.memory_space<vmem>>, vector<1x128x128xf32>
    %29 = vector.shape_cast %28 : vector<1x128x128xf32> to vector<128x128xf32>
    %cst_11 = arith.constant dense<0.000000e+00> : vector<128x128xf32>
    %30 = tpu.matmul %26, %29, %cst_11 {dimension_numbers = #tpu.dot_dimension_numbers<[1], [0], [0], [1], [0, 0, 1, 1], [], []>} : vector<128x128xf32>, vector<128x128xf32>, vector<128x128xf32> -> vector<128x128xf32>
    %31 = arith.index_cast %c0_i32 : i32 to index
    %c0_12 = arith.constant 0 : index
    %c0_13 = arith.constant 0 : index
    %32 = vector.load %arg5[%31, %c0_12, %c0_13] : memref<3x1x128xf32, #tpu.memory_space<vmem>>, vector<1x1x128xf32>
    %33 = vector.shape_cast %32 : vector<1x1x128xf32> to vector<1x128xf32>
    %34 = vector.broadcast %33 : vector<1x128xf32> to vector<128x128xf32>
    %35 = arith.addf %30, %34 : vector<128x128xf32>
    %36 = vector.broadcast %17 : f32 to vector<128x128xf32>
    %37 = arith.mulf %35, %36 : vector<128x128xf32>
    %38 = vector.broadcast %21 : f32 to vector<128x128xf32>
    %39 = arith.addf %37, %38 : vector<128x128xf32>
    %40 = math.tanh %39 : vector<128x128xf32>
    %41 = arith.index_cast %c0_i32 : i32 to index
    %c0_14 = arith.constant 0 : index
    %c0_15 = arith.constant 0 : index
    %42 = vector.load %arg6[%41, %c0_14, %c0_15] : memref<3x128x128xf32, #tpu.memory_space<vmem>>, vector<1x128x128xf32>
    %43 = vector.shape_cast %42 : vector<1x128x128xf32> to vector<128x128xf32>
    %cst_16 = arith.constant dense<0.000000e+00> : vector<128x128xf32>
    %44 = tpu.matmul %40, %43, %cst_16 {dimension_numbers = #tpu.dot_dimension_numbers<[1], [0], [0], [1], [0, 0, 1, 1], [], []>} : vector<128x128xf32>, vector<128x128xf32>, vector<128x128xf32> -> vector<128x128xf32>
    %45 = arith.index_cast %c0_i32 : i32 to index
    %c0_17 = arith.constant 0 : index
    %c0_18 = arith.constant 0 : index
    %46 = vector.load %arg7[%45, %c0_17, %c0_18] : memref<3x1x128xf32, #tpu.memory_space<vmem>>, vector<1x1x128xf32>
    %47 = vector.shape_cast %46 : vector<1x1x128xf32> to vector<1x128xf32>
    %48 = vector.broadcast %47 : vector<1x128xf32> to vector<128x128xf32>
    %49 = arith.addf %44, %48 : vector<128x128xf32>
    %50 = arith.addf %49, %5 : vector<128x128xf32>
    %c1_i32_19 = arith.constant 1 : i32
    %c4_i32_20 = arith.constant 4 : i32
    %51 = arith.muli %c4_i32_20, %c1_i32_19 : i32
    %c0_i32_21 = arith.constant 0 : i32
    %52 = arith.addi %51, %c0_i32_21 : i32
    %53 = arith.index_cast %52 : i32 to index
    %54 = memref.load %arg8[%53] : memref<12xf32, #tpu.memory_space<smem>>
    %c4_i32_22 = arith.constant 4 : i32
    %55 = arith.muli %c4_i32_22, %c1_i32_19 : i32
    %c1_i32_23 = arith.constant 1 : i32
    %56 = arith.addi %55, %c1_i32_23 : i32
    %57 = arith.index_cast %56 : i32 to index
    %58 = memref.load %arg8[%57] : memref<12xf32, #tpu.memory_space<smem>>
    %c4_i32_24 = arith.constant 4 : i32
    %59 = arith.muli %c4_i32_24, %c1_i32_19 : i32
    %c2_i32_25 = arith.constant 2 : i32
    %60 = arith.addi %59, %c2_i32_25 : i32
    %61 = arith.index_cast %60 : i32 to index
    %62 = memref.load %arg8[%61] : memref<12xf32, #tpu.memory_space<smem>>
    %c4_i32_26 = arith.constant 4 : i32
    %63 = arith.muli %c4_i32_26, %c1_i32_19 : i32
    %c3_i32_27 = arith.constant 3 : i32
    %64 = arith.addi %63, %c3_i32_27 : i32
    %65 = arith.index_cast %64 : i32 to index
    %66 = memref.load %arg8[%65] : memref<12xf32, #tpu.memory_space<smem>>
    %67 = vector.broadcast %54 : f32 to vector<128x128xf32>
    %68 = arith.mulf %50, %67 : vector<128x128xf32>
    %69 = vector.broadcast %58 : f32 to vector<128x128xf32>
    %70 = arith.addf %68, %69 : vector<128x128xf32>
    %71 = math.tanh %70 : vector<128x128xf32>
    %72 = arith.index_cast %c1_i32_19 : i32 to index
    %c0_28 = arith.constant 0 : index
    %c0_29 = arith.constant 0 : index
    %73 = vector.load %arg4[%72, %c0_28, %c0_29] : memref<3x128x128xf32, #tpu.memory_space<vmem>>, vector<1x128x128xf32>
    %74 = vector.shape_cast %73 : vector<1x128x128xf32> to vector<128x128xf32>
    %cst_30 = arith.constant dense<0.000000e+00> : vector<128x128xf32>
    %75 = tpu.matmul %71, %74, %cst_30 {dimension_numbers = #tpu.dot_dimension_numbers<[1], [0], [0], [1], [0, 0, 1, 1], [], []>} : vector<128x128xf32>, vector<128x128xf32>, vector<128x128xf32> -> vector<128x128xf32>
    %76 = arith.index_cast %c1_i32_19 : i32 to index
    %c0_31 = arith.constant 0 : index
    %c0_32 = arith.constant 0 : index
    %77 = vector.load %arg5[%76, %c0_31, %c0_32] : memref<3x1x128xf32, #tpu.memory_space<vmem>>, vector<1x1x128xf32>
    %78 = vector.shape_cast %77 : vector<1x1x128xf32> to vector<1x128xf32>
    %79 = vector.broadcast %78 : vector<1x128xf32> to vector<128x128xf32>
    %80 = arith.addf %75, %79 : vector<128x128xf32>
    %81 = vector.broadcast %62 : f32 to vector<128x128xf32>
    %82 = arith.mulf %80, %81 : vector<128x128xf32>
    %83 = vector.broadcast %66 : f32 to vector<128x128xf32>
    %84 = arith.addf %82, %83 : vector<128x128xf32>
    %85 = math.tanh %84 : vector<128x128xf32>
    %86 = arith.index_cast %c1_i32_19 : i32 to index
    %c0_33 = arith.constant 0 : index
    %c0_34 = arith.constant 0 : index
    %87 = vector.load %arg6[%86, %c0_33, %c0_34] : memref<3x128x128xf32, #tpu.memory_space<vmem>>, vector<1x128x128xf32>
    %88 = vector.shape_cast %87 : vector<1x128x128xf32> to vector<128x128xf32>
    %cst_35 = arith.constant dense<0.000000e+00> : vector<128x128xf32>
    %89 = tpu.matmul %85, %88, %cst_35 {dimension_numbers = #tpu.dot_dimension_numbers<[1], [0], [0], [1], [0, 0, 1, 1], [], []>} : vector<128x128xf32>, vector<128x128xf32>, vector<128x128xf32> -> vector<128x128xf32>
    %90 = arith.index_cast %c1_i32_19 : i32 to index
    %c0_36 = arith.constant 0 : index
    %c0_37 = arith.constant 0 : index
    %91 = vector.load %arg7[%90, %c0_36, %c0_37] : memref<3x1x128xf32, #tpu.memory_space<vmem>>, vector<1x1x128xf32>
    %92 = vector.shape_cast %91 : vector<1x1x128xf32> to vector<1x128xf32>
    %93 = vector.broadcast %92 : vector<1x128xf32> to vector<128x128xf32>
    %94 = arith.addf %89, %93 : vector<128x128xf32>
    %95 = arith.addf %94, %50 : vector<128x128xf32>
    %c2_i32_38 = arith.constant 2 : i32
    %c4_i32_39 = arith.constant 4 : i32
    %96 = arith.muli %c4_i32_39, %c2_i32_38 : i32
    %c0_i32_40 = arith.constant 0 : i32
    %97 = arith.addi %96, %c0_i32_40 : i32
    %98 = arith.index_cast %97 : i32 to index
    %99 = memref.load %arg8[%98] : memref<12xf32, #tpu.memory_space<smem>>
    %c4_i32_41 = arith.constant 4 : i32
    %100 = arith.muli %c4_i32_41, %c2_i32_38 : i32
    %c1_i32_42 = arith.constant 1 : i32
    %101 = arith.addi %100, %c1_i32_42 : i32
    %102 = arith.index_cast %101 : i32 to index
    %103 = memref.load %arg8[%102] : memref<12xf32, #tpu.memory_space<smem>>
    %c4_i32_43 = arith.constant 4 : i32
    %104 = arith.muli %c4_i32_43, %c2_i32_38 : i32
    %c2_i32_44 = arith.constant 2 : i32
    %105 = arith.addi %104, %c2_i32_44 : i32
    %106 = arith.index_cast %105 : i32 to index
    %107 = memref.load %arg8[%106] : memref<12xf32, #tpu.memory_space<smem>>
    %c4_i32_45 = arith.constant 4 : i32
    %108 = arith.muli %c4_i32_45, %c2_i32_38 : i32
    %c3_i32_46 = arith.constant 3 : i32
    %109 = arith.addi %108, %c3_i32_46 : i32
    %110 = arith.index_cast %109 : i32 to index
    %111 = memref.load %arg8[%110] : memref<12xf32, #tpu.memory_space<smem>>
    %112 = vector.broadcast %99 : f32 to vector<128x128xf32>
    %113 = arith.mulf %95, %112 : vector<128x128xf32>
    %114 = vector.broadcast %103 : f32 to vector<128x128xf32>
    %115 = arith.addf %113, %114 : vector<128x128xf32>
    %116 = math.tanh %115 : vector<128x128xf32>
    %117 = arith.index_cast %c2_i32_38 : i32 to index
    %c0_47 = arith.constant 0 : index
    %c0_48 = arith.constant 0 : index
    %118 = vector.load %arg4[%117, %c0_47, %c0_48] : memref<3x128x128xf32, #tpu.memory_space<vmem>>, vector<1x128x128xf32>
    %119 = vector.shape_cast %118 : vector<1x128x128xf32> to vector<128x128xf32>
    %cst_49 = arith.constant dense<0.000000e+00> : vector<128x128xf32>
    %120 = tpu.matmul %116, %119, %cst_49 {dimension_numbers = #tpu.dot_dimension_numbers<[1], [0], [0], [1], [0, 0, 1, 1], [], []>} : vector<128x128xf32>, vector<128x128xf32>, vector<128x128xf32> -> vector<128x128xf32>
    %121 = arith.index_cast %c2_i32_38 : i32 to index
    %c0_50 = arith.constant 0 : index
    %c0_51 = arith.constant 0 : index
    %122 = vector.load %arg5[%121, %c0_50, %c0_51] : memref<3x1x128xf32, #tpu.memory_space<vmem>>, vector<1x1x128xf32>
    %123 = vector.shape_cast %122 : vector<1x1x128xf32> to vector<1x128xf32>
    %124 = vector.broadcast %123 : vector<1x128xf32> to vector<128x128xf32>
    %125 = arith.addf %120, %124 : vector<128x128xf32>
    %126 = vector.broadcast %107 : f32 to vector<128x128xf32>
    %127 = arith.mulf %125, %126 : vector<128x128xf32>
    %128 = vector.broadcast %111 : f32 to vector<128x128xf32>
    %129 = arith.addf %127, %128 : vector<128x128xf32>
    %130 = math.tanh %129 : vector<128x128xf32>
    %131 = arith.index_cast %c2_i32_38 : i32 to index
    %c0_52 = arith.constant 0 : index
    %c0_53 = arith.constant 0 : index
    %132 = vector.load %arg6[%131, %c0_52, %c0_53] : memref<3x128x128xf32, #tpu.memory_space<vmem>>, vector<1x128x128xf32>
    %133 = vector.shape_cast %132 : vector<1x128x128xf32> to vector<128x128xf32>
    %cst_54 = arith.constant dense<0.000000e+00> : vector<128x128xf32>
    %134 = tpu.matmul %130, %133, %cst_54 {dimension_numbers = #tpu.dot_dimension_numbers<[1], [0], [0], [1], [0, 0, 1, 1], [], []>} : vector<128x128xf32>, vector<128x128xf32>, vector<128x128xf32> -> vector<128x128xf32>
    %135 = arith.index_cast %c2_i32_38 : i32 to index
    %c0_55 = arith.constant 0 : index
    %c0_56 = arith.constant 0 : index
    %136 = vector.load %arg7[%135, %c0_55, %c0_56] : memref<3x1x128xf32, #tpu.memory_space<vmem>>, vector<1x1x128xf32>
    %137 = vector.shape_cast %136 : vector<1x1x128xf32> to vector<1x128xf32>
    %138 = vector.broadcast %137 : vector<1x128xf32> to vector<128x128xf32>
    %139 = arith.addf %134, %138 : vector<128x128xf32>
    %140 = arith.addf %139, %95 : vector<128x128xf32>
    %c3_i32_57 = arith.constant 3 : i32
    %141 = math.tanh %140 : vector<128x128xf32>
    %c0_58 = arith.constant 0 : index
    %c0_59 = arith.constant 0 : index
    %142 = vector.load %arg9[%c0_58, %c0_59] : memref<128x4xf32, #tpu.memory_space<vmem>>, vector<128x4xf32>
    %cst_60 = arith.constant dense<0.000000e+00> : vector<128x4xf32>
    %143 = tpu.matmul %141, %142, %cst_60 {dimension_numbers = #tpu.dot_dimension_numbers<[1], [0], [0], [1], [0, 0, 1, 1], [], []>} : vector<128x128xf32>, vector<128x4xf32>, vector<128x4xf32> -> vector<128x4xf32>
    %c0_61 = arith.constant 0 : index
    %c0_62 = arith.constant 0 : index
    %144 = vector.load %arg10[%c0_61, %c0_62] : memref<1x4xf32, #tpu.memory_space<vmem>>, vector<1x4xf32>
    %145 = vector.broadcast %144 : vector<1x4xf32> to vector<128x4xf32>
    %146 = arith.addf %143, %145 : vector<128x4xf32>
    %c0_63 = arith.constant 0 : index
    %147 = memref.load %arg11[%c0_63] : memref<2xf32, #tpu.memory_space<smem>>
    %148 = vector.broadcast %147 : f32 to vector<128x4xf32>
    %149 = arith.mulf %146, %148 : vector<128x4xf32>
    %c1 = arith.constant 1 : index
    %150 = memref.load %arg11[%c1] : memref<2xf32, #tpu.memory_space<smem>>
    %151 = vector.broadcast %150 : f32 to vector<128x4xf32>
    %152 = arith.addf %149, %151 : vector<128x4xf32>
    %c0_64 = arith.constant 0 : index
    %c0_65 = arith.constant 0 : index
    %153 = vector.load %arg12[%c0_64, %c0_65] : memref<128x4xf32, #tpu.memory_space<vmem>>, vector<128x4xf32>
    tpu.vector_store %arg12[%c0_64, %c0_65], %152 {strides = array<i32>} : memref<128x4xf32, #tpu.memory_space<vmem>>, vector<128x4xf32>,
    return
  }
  func.func @transform_0(%arg0: i32) -> (i32, i32) {
    %c0_i32 = arith.constant 0 : i32
    %c0_i32_0 = arith.constant 0 : i32
    return %arg0, %c0_i32 : i32, i32
  }
  func.func @transform_1(%arg0: i32) -> (i32, i32) {
    %c0_i32 = arith.constant 0 : i32
    %c0_i32_0 = arith.constant 0 : i32
    %c0_i32_1 = arith.constant 0 : i32
    return %c0_i32, %c0_i32_0 : i32, i32
  }
  func.func @transform_2(%arg0: i32) -> (i32, i32) {
    %c0_i32 = arith.constant 0 : i32
    %c0_i32_0 = arith.constant 0 : i32
    %c0_i32_1 = arith.constant 0 : i32
    return %c0_i32, %c0_i32_0 : i32, i32
  }
  func.func @transform_3(%arg0: i32) -> (i32, i32, i32) {
    %c0_i32 = arith.constant 0 : i32
    %c0_i32_0 = arith.constant 0 : i32
    %c0_i32_1 = arith.constant 0 : i32
    %c0_i32_2 = arith.constant 0 : i32
    return %c0_i32, %c0_i32_0, %c0_i32_1 : i32, i32, i32
  }
  func.func @transform_4(%arg0: i32) -> (i32, i32, i32) {
    %c0_i32 = arith.constant 0 : i32
    %c0_i32_0 = arith.constant 0 : i32
    %c0_i32_1 = arith.constant 0 : i32
    %c0_i32_2 = arith.constant 0 : i32
    return %c0_i32, %c0_i32_0, %c0_i32_1 : i32, i32, i32
  }
  func.func @transform_5(%arg0: i32) -> (i32, i32, i32) {
    %c0_i32 = arith.constant 0 : i32
    %c0_i32_0 = arith.constant 0 : i32
    %c0_i32_1 = arith.constant 0 : i32
    %c0_i32_2 = arith.constant 0 : i32
    return %c0_i32, %c0_i32_0, %c0_i32_1 : i32, i32, i32
  }
  func.func @transform_6(%arg0: i32) -> (i32, i32, i32) {
    %c0_i32 = arith.constant 0 : i32
    %c0_i32_0 = arith.constant 0 : i32
    %c0_i32_1 = arith.constant 0 : i32
    %c0_i32_2 = arith.constant 0 : i32
    return %c0_i32, %c0_i32_0, %c0_i32_1 : i32, i32, i32
  }
  func.func @transform_7(%arg0: i32) -> i32 {
    %c0_i32 = arith.constant 0 : i32
    %c0_i32_0 = arith.constant 0 : i32
    return %c0_i32 : i32
  }
  func.func @transform_8(%arg0: i32) -> (i32, i32) {
    %c0_i32 = arith.constant 0 : i32
    %c0_i32_0 = arith.constant 0 : i32
    %c0_i32_1 = arith.constant 0 : i32
    return %c0_i32, %c0_i32_0 : i32, i32
  }
  func.func @transform_9(%arg0: i32) -> (i32, i32) {
    %c0_i32 = arith.constant 0 : i32
    %c0_i32_0 = arith.constant 0 : i32
    %c0_i32_1 = arith.constant 0 : i32
    return %c0_i32, %c0_i32_0 : i32, i32
  }
  func.func @transform_10(%arg0: i32) -> i32 {
    %c0_i32 = arith.constant 0 : i32
    %c0_i32_0 = arith.constant 0 : i32
    return %c0_i32 : i32
  }
  func.func @transform_11(%arg0: i32) -> (i32, i32) {
    %c0_i32 = arith.constant 0 : i32
    %c0_i32_0 = arith.constant 0 : i32
    return %arg0, %c0_i32 : i32, i32
  }
}

</mosaic_0001>

<bundles_post_ra>
// kernel: tpu_custom_call.1
= control target key start
LH: loop header
LB: loop body
LE: loop exit
PB: predicated region body
PF: predicated region fallthrough
CT: control target
= control target key end

     0   :  { %16 = vsyncpa [#allocation3], 0  ;;  %s4765_s0 = inlined_call_operand.vmem [shape: f32[256,8], index: 0, kind: input, shape index: {}]   ;;  %s4766_s1 = inlined_call_operand.vmem [shape: f32[8,128], index: 1, kind: input, shape index: {}]   ;;  %s4767_s2 = inlined_call_operand.vmem [shape: f32[1,128], index: 2, kind: input, shape index: {}]   ;;  %s4768_s3 = inlined_call_operand.vmem [shape: f32[3,128,128], index: 3, kind: input, shape index: {}]   ;;  %s4769_s4 = inlined_call_operand.vmem [shape: f32[3,1,128], index: 4, kind: input, shape index: {}]   ;;  %s4770_s5 = inlined_call_operand.hbm [shape: f32[3,128,128], index: 5, kind: input, shape index: {}]   ;;  %s4771_s6 = inlined_call_operand.vmem [shape: f32[3,1,128], index: 6, kind: input, shape index: {}]   ;;  %s4772_s7 = inlined_call_operand.vmem [shape: f32[12], index: 7, kind: input, shape index: {}]   ;;  %s4773_s8 = inlined_call_operand.vmem [shape: f32[128,4], index: 8, kind: input, shape index: {}]   ;;  %s4774_s9 = inlined_call_operand.vmem [shape: f32[1,4], index: 9, kind: input, shape index: {}]   ;;  %s4775_s10 = inlined_call_operand.vmem [shape: f32[2], index: 10, kind: input, shape index: {}]   ;;  %s4776_s11 = inlined_call_operand.vmem [shape: f32[256,4], index: 11, kind: output, shape index: {}]  }
   0x1   :  { %17 = vsyncpa [#allocation4], 0 }
   0x2   :  { %18 = vsyncpa [#allocation7], 0  ;;  %s3749_s17 = smov 0  }
   0x3 LB: > { %s3684_s18 = smov [#allocation2]   ;;  %s2353_s20 = sadd.s32 4294967295, %s3682_s17   ;;  %s3682_s17 = sphi %s3749_s17, %s24_s17  }
   0x4   : > { %s315_s19 = sshll.u32 %s3684_s18, 4  ;;  %p2355_p0 = scmp.ge.s32.totalorder %s3682_s17, 1  ;;  %s3767_s19 = int_to_ptr.vmem [resolvable:$true] %s315_s19 }
   0x5   : > { %p291_p1 = scmp.lt.s32.totalorder %s3682_s17, 3  ;;  %p3763_p3 = scmp.eq.s32.totalorder %s2353_s20, 0 }
   0x6   : > { %s332_s25 = sshll.u32 %s4772_s7, 4  ;;  %s349_s28 = sshll.u32 %s4775_s10, 4  ;;  %s3783_s25 = int_to_ptr.vmem [resolvable:$true] %s332_s25  ;;  %s3785_s28 = int_to_ptr.vmem [resolvable:$true] %s349_s28 }
   0x7   : > { %p3757_p2 = pnand %p2355_p0, %p291_p1  ;;  %s3606_s13 = scalar_lea.hbm %s4770_s5, 6144 }
   0x8   : > { %p3607_p6 = scmp.ne.s32.totalorder %s4770_s5, %s3606_s13  ;;  %p3613_p10 = scmp.lt.u32.totalorder %s3606_s13, %s4770_s5 }
   0x9   : > { %p3353_p4 = pneg %p3757_p2 }
   0xb   : > { %p3779_p5 = pnand %p3763_p3, %p3353_p4 }
   0xd   : > { %p3608_p7 = pneg %p3779_p5 }
   0xf   : > { %p3609_p8 = pnand %p3608_p7, %p3607_p6 }
  0x11   : > { %p3610_p9 = pneg %p3609_p8 }
  0x13   : > { %p3615_p11 = pnand %p3613_p10, %p3610_p9 }
  0x15   : > { %3618 = shalt.err (!%p3615_p11)
}
  0x16   : > { %s3619_s23 = scalar_lea.vmem %s3767_s19, 6144  ;;  %p3627_p1 = scmp.lt.s32.totalorder %s3767_s19, %s3767_s19 }
  0x17   : > { %p3620_p12 = scmp.ne.s32.totalorder %s3767_s19, %s3619_s23  ;;  %p3628_p4 = scmp.lt.s32.totalorder %s3619_s23, %s3619_s23 }
  0x19   : > { %p3622_p13 = pnand %p3620_p12, %p3608_p7  ;;  %p3629_p6 = por %p3628_p4, %p3627_p1 }
  0x1b   : > { %p3623_p0 = pneg %p3622_p13 }
  0x1d   : > { %p3630_p8 = pnand %p3629_p6, %p3623_p0 }
  0x1f   : > { %3633 = shalt.err (!%p3630_p8)
}
  0x20   : > { %s3685_s24 = smov 128   ;;  %s3686_s26 = smov 8  }
  0x21   : > { %3356 = dma.hbm_to_vmem [thread:$0]  (!%p3779_p5), %s4770_s5, 6144, %s3767_s19, [#allocation3], %s3685_s24, %s3685_s24, %s3686_s26  }
  0x22   : > { %s3634_s12 = scalar_lea.vmem %s3783_s25, 16  ;;  %p3642_p12 = scmp.lt.s32.totalorder %s3783_s25, %s3783_s25 }
  0x23   : > { %p3635_p9 = scmp.ne.s32.totalorder %s3783_s25, %s3634_s12  ;;  %p3643_p13 = scmp.lt.s32.totalorder %s3634_s12, %s3634_s12 }
  0x25   : > { %p3637_p10 = pnand %p3635_p9, %p3608_p7  ;;  %p3644_p0 = por %p3643_p13, %p3642_p12 }
  0x27   : > { %p3638_p11 = pneg %p3637_p10 }
  0x29   : > { %p3645_p1 = pnand %p3644_p0, %p3638_p11 }
  0x2b   : > { %3648 = shalt.err (!%p3645_p1)
}
  0x2c   : > { %s3687_s13 = smov [#allocation5]   ;;  %s3649_s19 = scalar_lea.vmem %s3785_s28, 16 }
  0x2d   : > { %3359 = dma.vmem_to_smem (!%p3779_p5), %s3783_s25, 16, %s3687_s13, [#allocation4]  }
  0x2e   : > { %p3650_p4 = scmp.ne.s32.totalorder %s3785_s28, %s3649_s19  ;;  %p3657_p9 = scmp.lt.s32.totalorder %s3785_s28, %s3785_s28 }
  0x2f   : > { %p3658_p10 = scmp.lt.s32.totalorder %s3649_s19, %s3649_s19 }
  0x30   : > { %p3652_p6 = pnand %p3650_p4, %p3608_p7 }
  0x31   : > { %p3659_p11 = por %p3658_p10, %p3657_p9 }
  0x32   : > { %p3653_p8 = pneg %p3652_p6 }
  0x34   : > { %p3660_p12 = pnand %p3659_p11, %p3653_p8 }
  0x36   : > { %3663 = shalt.err (!%p3660_p12)
}
  0x37   : > { %s3688_s14 = smov [#allocation6]   ;;  %371 = sbr.rel (%p3757_p2) target bundleno = 1944 (0x798), region = 64 }
  0x38   : > { %3362 = dma.vmem_to_smem (!%p3779_p5), %s3785_s28, 16, %s3688_s14, [#allocation7]  }
  0x3e   : > { %3669 = dma.done.wait (%p3763_p3), [#allocation3], 6144  }
  0x3f   : > { %3671 = vsyncadd (%p3763_p3), [#allocation3], 4294961152 }
  0x40   : > { %3673 = dma.done.wait (%p3763_p3), [#allocation4], 16  }
  0x41   : > { %3675 = vsyncadd (%p3763_p3), [#allocation4], 4294967280 }
  0x42   : > { %3677 = dma.done.wait (%p3763_p3), [#allocation7], 16  }
  0x43   : > { %3679 = vsyncadd (%p3763_p3), [#allocation7], 4294967280 }
  0x44   : > { %385 = sfence }
  0x45   : > { %v448_v0 = vld [vmem:[%s4766_s1] sm:$0xff]  ;;  %s2364_s28 = sshll.u32 %s2353_s20, 4  ;;  %v705_v2 = vld [vmem:[%s4768_s3 + $0x8] sm:$0xff]  ;;  %v706_v4 = vld [vmem:[%s4768_s3 + $0x10] sm:$0xff]  ;;  %vm456_vm0 = vcmask 64512   ;;  %s650_s18 = sld [smem:[#allocation5]] }
  0x46   : > { %v704_v1 = vld [vmem:[%s4768_s3] sm:$0xff]  ;;  %2683 = vmatprep.subr.mxu0 %v448_v0  ;;  %p421_p2 = scmp.lt.s32.totalorder %s2364_s28, 31  ;;  %v707_v5 = vld [vmem:[%s4768_s3 + $0x18] sm:$0xff]  ;;  %v709_v8 = vld [vmem:[%s4768_s3 + $0x28] sm:$0xff]  ;;  %s2385_s22 = sld [smem:[#allocation5 + $0x1]]  ;;  %vm2246_vm1 = vcmask 31744  }
  0x47   : > { %v3101_v3 = vpack.c.bf16 %v705_v2, %v704_v1  ;;  %2684 = vmatpush3.msra.mxu0 %v448_v0  ;;  %v3105_v6 = vpack.c.bf16 %v707_v5, %v706_v4  ;;  %v708_v7 = vld [vmem:[%s4768_s3 + $0x20] sm:$0xff]  ;;  %v710_v26 = vld [vmem:[%s4768_s3 + $0x30] sm:$0xff]  ;;  %v711_v27 = vld [vmem:[%s4768_s3 + $0x38] sm:$0xff]  ;;  %s2390_s12 = sld [smem:[#allocation5 + $0x4]]  ;;  %s2391_s19 = sld [smem:[#allocation5 + $0x5]] }
  0x48   : > { %s4781_s28 = smov (!%p421_p2, %s2364_s28), 31  ;;  %v3109_v9 = vpack.c.bf16 %v709_v8, %v708_v7  ;;  %v3113_v28 = vpack.c.bf16 %v711_v27, %v710_v26  ;;  %v712_v29 = vld [vmem:[%s4768_s3 + $0x40] sm:$0xff]  ;;  %v713_v30 = vld [vmem:[%s4768_s3 + $0x48] sm:$0xff]  ;;  %v714_v32 = vld [vmem:[%s4768_s3 + $0x50] sm:$0xff]  ;;  %s2416_s26 = sld [smem:[#allocation5 + $0xa]] }
  0x49   : > { %3102 = vmatprep.subr.bf16.mxu1 %v3101_v3  ;;  %s2365_s13 = sshll.u32 %s4781_s28, 3  ;;  %v3117_v31 = vpack.c.bf16 %v713_v30, %v712_v29  ;;  %v715_v33 = vld [vmem:[%s4768_s3 + $0x58] sm:$0xff]  ;;  %v716_v35 = vld [vmem:[%s4768_s3 + $0x60] sm:$0xff]  ;;  %v717_v36 = vld [vmem:[%s4768_s3 + $0x68] sm:$0xff]  ;;  %s2417_s20 = sld [smem:[#allocation5 + $0xb]] }
  0x4a   : > { %3104 = vmatpush3.bf16.msra.mxu1 %v3101_v3  ;;  %s3879_s21 = scalar_lea.vmem %s4765_s0, %s2365_s13  ;;  %v3121_v34 = vpack.c.bf16 %v715_v33, %v714_v32  ;;  %v3125_v37 = vpack.c.bf16 %v717_v36, %v716_v35  ;;  %v718_v38 = vld [vmem:[%s4768_s3 + $0x70] sm:$0xff]  ;;  %v719_v39 = vld [vmem:[%s4768_s3 + $0x78] sm:$0xff]  ;;  %v922_v41 = vld [vmem:[#allocation2] sm:$0xff]  ;;  %s2210_s14 = sld [smem:[#allocation6]] }
  0x4b   : > { %3106 = vmatprep.subr.bf16.mxu1 %v3105_v6  ;;  %v432_v10 = vld [vmem:[%s3879_s21] sm:$0xff]  ;;  %v433_v11 = vld [vmem:[%s3879_s21 + $0x8] sm:$0xff]  ;;  %v434_v12 = vld [vmem:[%s3879_s21 + $0x10] sm:$0xff]  ;;  %v3129_v40 = vpack.c.bf16 %v719_v39, %v718_v38  ;;  %v3948_v55 = vstv %s650_s18  ;;  %s2386_s18 = sld [smem:[#allocation5 + $0x2]] }
  0x4c   : > { %2685 = vmatprep.mubr.msk.f32.mxu0 %vm456_vm0, %v432_v10  ;;  %v435_v13 = vld [vmem:[%s3879_s21 + $0x18] sm:$0xff]  ;;  %v436_v14 = vld [vmem:[%s3879_s21 + $0x20] sm:$0xff]  ;;  %v437_v15 = vld [vmem:[%s3879_s21 + $0x28] sm:$0xff]  ;;  %v3953_v58 = vstv %s2385_s22  ;;  %s2387_s22 = sld [smem:[#allocation5 + $0x3]] }
  0x4d   : > { %2686 = vmatmul.mubr.msk.f32.vlgmr.msra.gmra.mrb[0].mxu0 %vm456_vm0, %v433_v11  ;;  %v438_v16 = vld [vmem:[%s3879_s21 + $0x30] sm:$0xff]  ;;  %v439_v17 = vld [vmem:[%s3879_s21 + $0x38] sm:$0xff]  ;;  %v440_v18 = vld [vmem:[%s3879_s21 + $0x40] sm:$0xff] }
  0x4e   : > { %3108 = vmatpush3.bf16.msra.mxu1 %v3105_v6  ;;  %2688 = vmatprep.mubr.msk.f32.mxu0 %vm456_vm0, %v434_v12  ;;  %v441_v19 = vld [vmem:[%s3879_s21 + $0x48] sm:$0xff]  ;;  %v442_v20 = vld [vmem:[%s3879_s21 + $0x50] sm:$0xff]  ;;  %v443_v21 = vld [vmem:[%s3879_s21 + $0x58] sm:$0xff] }
  0x4f   : > { %3110 = vmatprep.subr.bf16.mxu1 %v3109_v9  ;;  %v444_v22 = vld [vmem:[%s3879_s21 + $0x60] sm:$0xff]  ;;  %v445_v23 = vld [vmem:[%s3879_s21 + $0x68] sm:$0xff]  ;;  %v446_v24 = vld [vmem:[%s3879_s21 + $0x70] sm:$0xff] }
  0x50   : > { %v447_v25 = vld [vmem:[%s3879_s21 + $0x78] sm:$0xff]  ;;  %v923_v42 = vld [vmem:[#allocation2 + $0x8] sm:$0xff]  ;;  %v924_v43 = vld [vmem:[#allocation2 + $0x10] sm:$0xff]  ;;  %s2439_s21 = sld [smem:[#allocation6 + $0x1]] }
  0x51   : > { %2689 = vmatmul.mubr.msk.f32.gmra.mrb[2].mxu0 %vm456_vm0, %v435_v13  ;;  %v3133_v44 = vpack.c.bf16 %v923_v42, %v922_v41  ;;  %v925_v45 = vld [vmem:[#allocation2 + $0x18] sm:$0xff]  ;;  %v926_v47 = vld [vmem:[#allocation2 + $0x20] sm:$0xff]  ;;  %v927_v48 = vld [vmem:[#allocation2 + $0x28] sm:$0xff] }
  0x52   : > { %3112 = vmatpush3.bf16.msra.mxu1 %v3109_v9  ;;  %2691 = vmatprep.mubr.msk.f32.mxu0 %vm456_vm0, %v436_v14  ;;  %v3137_v46 = vpack.c.bf16 %v925_v45, %v924_v43  ;;  %v3141_v49 = vpack.c.bf16 %v927_v48, %v926_v47  ;;  %v928_v50 = vld [vmem:[#allocation2 + $0x30] sm:$0xff]  ;;  %v929_v51 = vld [vmem:[#allocation2 + $0x38] sm:$0xff]  ;;  %v3946_v53 = vld [vmem:[%s4767_s2] ss:$0 sm:$0xff] }
  0x53   : > { %3114 = vmatprep.subr.bf16.mxu1 %v3113_v28  ;;  %3134 = vmatprep.subr.bf16.mxu0 %v3133_v44  ;;  %v3145_v52 = vpack.c.bf16 %v929_v51, %v928_v50 }
  0x54   : > { %3136 = vmatpush3.bf16.msra.mxu0 %v3133_v44 }
  0x55   : > { %2692 = vmatmul.mubr.msk.f32.gmra.mrb[4].mxu0 %vm456_vm0, %v437_v15  ;;  %3138 = vmatprep.subr.bf16.mxu0 %v3137_v46 }
  0x56   : > { %2694 = vmatprep.mubr.msk.f32.mxu0 %vm456_vm0, %v438_v16  ;;  %3116 = vmatpush3.bf16.msra.mxu1 %v3113_v28 }
  0x57   : > { %3118 = vmatprep.subr.bf16.mxu1 %v3117_v31 }
  0x58   : > { %3140 = vmatpush3.bf16.msra.mxu0 %v3137_v46 }
  0x59   : > { %2695 = vmatmul.mubr.msk.f32.gmra.mrb[6].mxu0 %vm456_vm0, %v439_v17  ;;  %3142 = vmatprep.subr.bf16.mxu0 %v3141_v49 }
  0x5a   : > { %2697 = vmatprep.mubr.msk.f32.mxu0 %vm456_vm0, %v440_v18  ;;  %3120 = vmatpush3.bf16.msra.mxu1 %v3117_v31 }
  0x5b   : > { %3122 = vmatprep.subr.bf16.mxu1 %v3121_v34 }
  0x5c   : > { %3144 = vmatpush3.bf16.msra.mxu0 %v3141_v49 }
  0x5d   : > { %2698 = vmatmul.mubr.msk.f32.gmra.mrb[8].mxu0 %vm456_vm0, %v441_v19  ;;  %3146 = vmatprep.subr.bf16.mxu0 %v3145_v52 }
  0x5e   : > { %2700 = vmatprep.mubr.msk.f32.mxu0 %vm456_vm0, %v442_v20  ;;  %3124 = vmatpush3.bf16.msra.mxu1 %v3121_v34 }
  0x5f   : > { %3126 = vmatprep.subr.bf16.mxu1 %v3125_v37 }
  0x60   : > { %3148 = vmatpush3.bf16.msra.mxu0 %v3145_v52 }
  0x61   : > { %2701 = vmatmul.mubr.msk.f32.gmra.mrb[10].mxu0 %vm456_vm0, %v443_v21 }
  0x62   : > { %2703 = vmatprep.mubr.msk.f32.mxu0 %vm456_vm0, %v444_v22  ;;  %3128 = vmatpush3.bf16.msra.mxu1 %v3125_v37 }
  0x63   : > { %3130 = vmatprep.subr.bf16.mxu1 %v3129_v40 }
  0x65   : > { %2704 = vmatmul.mubr.msk.f32.gmra.mrb[12].mxu0 %vm456_vm0, %v445_v23 }
  0x66   : > { %2706 = vmatprep.mubr.msk.f32.mxu0 %vm456_vm0, %v446_v24  ;;  %3132 = vmatpush3.bf16.msra.mxu1 %v3129_v40 }
  0x69   : > { %2707 = vmatmul.mubr.msk.f32.gmra.mrb[14].mxu0 %vm456_vm0, %v447_v25 }
 0x120   : > { %v2687_v54 = vpop.f32.mrb[0].mxu0 }
 0x121   : > { %v3951_v56 = vadd.f32 %v2687_v54, %v3946_v53  ;;  %v571_v57 = vpop.f32.mrb[1].mxu0 }
 0x122   : > { %v3956_v59 = vadd.f32 %v3946_v53, %v571_v57 }
 0x123   : > { %v656_v60 = vmul.f32 %v3948_v55, %v3951_v56 }
 0x124   : > { %v655_v61 = vmul.f32 %v3948_v55, %v3956_v59  ;;  %v2690_v62 = vpop.f32.mrb[2].mxu0 }
 0x125   : > { %v673_v63 = vadd.f32 %v3953_v58, %v656_v60  ;;  %v3964_v0 = vadd.f32 %v2690_v62, %v3946_v53  ;;  %v581_v1 = vpop.f32.mrb[3].mxu0 }
 0x126   : > { %v3967_v2 = vadd.f32 %v3946_v53, %v581_v1  ;;  %v672_v3 = vadd.f32 %v3953_v58, %v655_v61 }
 0x127   : > { %v658_v4 = vmul.f32 %v3948_v55, %v3964_v0 }
 0x128   : > { %v657_v5 = vmul.f32 %v3948_v55, %v3967_v2  ;;  %v2693_v6 = vpop.f32.mrb[4].mxu0  ;;  %3382 = vtanh.f32 %v672_v3 }
 0x129   : > { %3384 = vtanh.f32 %v673_v63  ;;  %v675_v7 = vadd.f32 %v3953_v58, %v658_v4  ;;  %v3976_v8 = vadd.f32 %v2693_v6, %v3946_v53  ;;  %v591_v9 = vpop.f32.mrb[5].mxu0 }
 0x12a   : > { %v674_v10 = vadd.f32 %v3953_v58, %v657_v5  ;;  %v3980_v11 = vadd.f32 %v3946_v53, %v591_v9 }
 0x12b   : > { %v660_v12 = vmul.f32 %v3948_v55, %v3976_v8 }
 0x12c   : > { %3386 = vtanh.f32 %v674_v10  ;;  %v659_v13 = vmul.f32 %v3948_v55, %v3980_v11  ;;  %v2696_v14 = vpop.f32.mrb[6].mxu0 }
 0x12d   : > { %3388 = vtanh.f32 %v675_v7  ;;  %v677_v15 = vadd.f32 %v3953_v58, %v660_v12  ;;  %v3988_v16 = vadd.f32 %v2696_v14, %v3946_v53  ;;  %v601_v17 = vpop.f32.mrb[7].mxu0 }
 0x12e   : > { %v676_v18 = vadd.f32 %v3953_v58, %v659_v13  ;;  %v3992_v19 = vadd.f32 %v3946_v53, %v601_v17  ;;  %v931_v17 = vld [vmem:[#allocation2 + $0x48] sm:$0xff] }
 0x12f   : > { %v662_v20 = vmul.f32 %v3948_v55, %v3988_v16 }
 0x130   : > { %3390 = vtanh.f32 %v676_v18  ;;  %v661_v21 = vmul.f32 %v3948_v55, %v3992_v19  ;;  %v2699_v22 = vpop.f32.mrb[8].mxu0  ;;  %v932_v18 = vld [vmem:[#allocation2 + $0x50] sm:$0xff] }
 0x131   : > { %3392 = vtanh.f32 %v677_v15  ;;  %v679_v23 = vadd.f32 %v3953_v58, %v662_v20  ;;  %v4000_v24 = vadd.f32 %v2699_v22, %v3946_v53  ;;  %v611_v25 = vpop.f32.mrb[9].mxu0  ;;  %v930_v15 = vld [vmem:[#allocation2 + $0x40] sm:$0xff]  ;;  %v933_v20 = vld [vmem:[#allocation2 + $0x58] sm:$0xff] }
 0x132   : > { %v3383_v26 = vpop.eup %3382  ;;  %v678_v27 = vadd.f32 %v3953_v58, %v661_v21  ;;  %v4004_v28 = vadd.f32 %v3946_v53, %v611_v25  ;;  %v3153_v21 = vpack.c.bf16 %v933_v20, %v932_v18  ;;  %v934_v22 = vld [vmem:[#allocation2 + $0x60] sm:$0xff] }
 0x133   : > { %v3385_v29 = vpop.eup %3384  ;;  %v664_v30 = vmul.f32 %v3948_v55, %v4000_v24  ;;  %2741 = vmatprep.mubr.f32.mxu1 %v3383_v26  ;;  %v936_v26 = vld [vmem:[#allocation2 + $0x70] sm:$0xff] }
 0x134   : > { %3394 = vtanh.f32 %v678_v27  ;;  %v663_v31 = vmul.f32 %v3948_v55, %v4004_v28  ;;  %v2702_v32 = vpop.f32.mrb[10].mxu0  ;;  %2742 = vmatmul.mubr.f32.vlgmr.msra.gmra.mrb[0].mxu1 %v3385_v29  ;;  %v937_v27 = vld [vmem:[#allocation2 + $0x78] sm:$0xff] }
 0x135   : > { %3396 = vtanh.f32 %v679_v23  ;;  %v681_v33 = vadd.f32 %v3953_v58, %v664_v30  ;;  %v4012_v34 = vadd.f32 %v2702_v32, %v3946_v53  ;;  %v621_v35 = vpop.f32.mrb[11].mxu0  ;;  %v935_v23 = vld [vmem:[#allocation2 + $0x68] sm:$0xff]  ;;  %v3161_v29 = vpack.c.bf16 %v937_v27, %v936_v26  ;;  %v2394_v30 = vld [vmem:[%s4768_s3 + $0x80] sm:$0xff]  ;;  %v2396_v32 = vld [vmem:[%s4768_s3 + $0x90] sm:$0xff] }
 0x136   : > { %v3387_v36 = vpop.eup %3386  ;;  %v680_v37 = vadd.f32 %v3953_v58, %v663_v31  ;;  %v4016_v38 = vadd.f32 %v3946_v53, %v621_v35  ;;  %v3157_v25 = vpack.c.bf16 %v935_v23, %v934_v22  ;;  %v2395_v31 = vld [vmem:[%s4768_s3 + $0x88] sm:$0xff]  ;;  %v2397_v35 = vld [vmem:[%s4768_s3 + $0x98] sm:$0xff] }
 0x137   : > { %v3389_v39 = vpop.eup %3388  ;;  %v666_v40 = vmul.f32 %v3948_v55, %v4012_v34  ;;  %2744 = vmatprep.mubr.f32.mxu1 %v3387_v36  ;;  %v3169_v36 = vpack.c.bf16 %v2397_v35, %v2396_v32 }
 0x138   : > { %3398 = vtanh.f32 %v680_v37  ;;  %v665_v41 = vmul.f32 %v3948_v55, %v4016_v38  ;;  %v2705_v42 = vpop.f32.mrb[12].mxu0  ;;  %2745 = vmatmul.mubr.f32.gmra.mrb[2].mxu1 %v3389_v39  ;;  %v2398_v37 = vld [vmem:[%s4768_s3 + $0xa0] sm:$0xff]  ;;  %v2399_v39 = vld [vmem:[%s4768_s3 + $0xa8] sm:$0xff] }
 0x139   : > { %3400 = vtanh.f32 %v681_v33  ;;  %v683_v43 = vadd.f32 %v3953_v58, %v666_v40  ;;  %v4024_v44 = vadd.f32 %v2705_v42, %v3946_v53  ;;  %v631_v45 = vpop.f32.mrb[13].mxu0  ;;  %v3165_v33 = vpack.c.bf16 %v2395_v31, %v2394_v30 }
 0x13a   : > { %v3391_v46 = vpop.eup %3390  ;;  %v682_v47 = vadd.f32 %v3953_v58, %v665_v41  ;;  %v4028_v48 = vadd.f32 %v3946_v53, %v631_v45  ;;  %v3173_v40 = vpack.c.bf16 %v2399_v39, %v2398_v37  ;;  %v4069_v41 = vld [vmem:[%s4769_s4] ss:$0 sm:$0xff] }
 0x13b   : > { %v3393_v49 = vpop.eup %3392  ;;  %v668_v50 = vmul.f32 %v3948_v55, %v4024_v44  ;;  %2747 = vmatprep.mubr.f32.mxu1 %v3391_v46  ;;  %3166 = vmatprep.subr.bf16.mxu1 %v3165_v33 }
 0x13c   : > { %3402 = vtanh.f32 %v682_v47  ;;  %v667_v51 = vmul.f32 %v3948_v55, %v4028_v48  ;;  %v2708_v52 = vpop.f32.mrb[14].mxu0  ;;  %2748 = vmatmul.mubr.f32.gmra.mrb[4].mxu1 %v3393_v49  ;;  %v4074_v47 = vstv %s2387_s22  ;;  %s2415_s22 = sld [smem:[#allocation5 + $0x9]] }
 0x13d   : > { %3404 = vtanh.f32 %v683_v43  ;;  %v685_v54 = vadd.f32 %v3953_v58, %v668_v50  ;;  %v4036_v57 = vadd.f32 %v2708_v52, %v3946_v53  ;;  %v641_v60 = vpop.f32.mrb[15].mxu0  ;;  %3168 = vmatpush3.bf16.msra.mxu1 %v3165_v33  ;;  %v4071_v43 = vstv %s2386_s18  ;;  %s2414_s18 = sld [smem:[#allocation5 + $0x8]] }
 0x13e   : > { %v3395_v61 = vpop.eup %3394  ;;  %v684_v62 = vadd.f32 %v3953_v58, %v667_v51  ;;  %v4040_v63 = vadd.f32 %v3946_v53, %v641_v60  ;;  %3170 = vmatprep.subr.bf16.mxu1 %v3169_v36 }
 0x13f   : > { %v3397_v1 = vpop.eup %3396  ;;  %v670_v3 = vmul.f32 %v3948_v55, %v4036_v57  ;;  %2750 = vmatprep.mubr.f32.mxu1 %v3395_v61 }
 0x140   : > { %3406 = vtanh.f32 %v684_v62  ;;  %v669_v4 = vmul.f32 %v3948_v55, %v4040_v63  ;;  %2751 = vmatmul.mubr.f32.gmra.mrb[6].mxu1 %v3397_v1 }
 0x141   : > { %3408 = vtanh.f32 %v685_v54  ;;  %v687_v5 = vadd.f32 %v3953_v58, %v670_v3  ;;  %3172 = vmatpush3.bf16.msra.mxu1 %v3169_v36 }
 0x142   : > { %v3399_v6 = vpop.eup %3398  ;;  %v686_v7 = vadd.f32 %v3953_v58, %v669_v4  ;;  %v3149_v58 = vpack.c.bf16 %v931_v17, %v930_v15  ;;  %3174 = vmatprep.subr.bf16.mxu1 %v3173_v40 }
 0x143   : > { %v3401_v9 = vpop.eup %3400  ;;  %2753 = vmatprep.mubr.f32.mxu1 %v3399_v6 }
 0x144   : > { %3410 = vtanh.f32 %v686_v7  ;;  %2754 = vmatmul.mubr.f32.gmra.mrb[8].mxu1 %v3401_v9  ;;  %3150 = vmatprep.subr.bf16.mxu0 %v3149_v58 }
 0x145   : > { %3412 = vtanh.f32 %v687_v5  ;;  %3152 = vmatpush3.bf16.msra.mxu0 %v3149_v58  ;;  %3176 = vmatpush3.bf16.msra.mxu1 %v3173_v40 }
 0x146   : > { %v3403_v53 = vpop.eup %3402  ;;  %3154 = vmatprep.subr.bf16.mxu0 %v3153_v21 }
 0x147   : > { %v3405_v10 = vpop.eup %3404  ;;  %2756 = vmatprep.mubr.f32.mxu1 %v3403_v53 }
 0x148   : > { %2757 = vmatmul.mubr.f32.gmra.mrb[10].mxu1 %v3405_v10 }
 0x149   : > { %3156 = vmatpush3.bf16.msra.mxu0 %v3153_v21 }
 0x14a   : > { %v3407_v12 = vpop.eup %3406  ;;  %3158 = vmatprep.subr.bf16.mxu0 %v3157_v25 }
 0x14b   : > { %v3409_v13 = vpop.eup %3408  ;;  %2759 = vmatprep.mubr.f32.mxu1 %v3407_v12 }
 0x14c   : > { %2760 = vmatmul.mubr.f32.gmra.mrb[12].mxu1 %v3409_v13 }
 0x14d   : > { %3160 = vmatpush3.bf16.msra.mxu0 %v3157_v25 }
 0x14e   : > { %v3411_v55 = vpop.eup %3410  ;;  %3162 = vmatprep.subr.bf16.mxu0 %v3161_v29 }
 0x14f   : > { %v3413_v14 = vpop.eup %3412  ;;  %2762 = vmatprep.mubr.f32.mxu1 %v3411_v55 }
 0x150   : > { %2763 = vmatmul.mubr.f32.gmra.mrb[14].mxu1 %v3413_v14 }
 0x151   : > { %3164 = vmatpush3.bf16.msra.mxu0 %v3161_v29 }
 0x207   : > { %v2743_v42 = vpop.f32.mrb[0].mxu1 }
 0x208   : > { %v799_v45 = vadd.f32 %v2743_v42, %v4069_v41  ;;  %v793_v46 = vpop.f32.mrb[1].mxu1 }
 0x209   : > { %v794_v49 = vadd.f32 %v4069_v41, %v793_v46 }
 0x20a   : > { %v874_v50 = vmul.f32 %v4071_v43, %v799_v45 }
 0x20b   : > { %v873_v51 = vmul.f32 %v4071_v43, %v794_v49  ;;  %v2746_v52 = vpop.f32.mrb[2].mxu1 }
 0x20c   : > { %v891_v54 = vadd.f32 %v4074_v47, %v874_v50  ;;  %v809_v60 = vadd.f32 %v2746_v52, %v4069_v41  ;;  %v803_v61 = vpop.f32.mrb[3].mxu1 }
 0x20d   : > { %v890_v62 = vadd.f32 %v4074_v47, %v873_v51  ;;  %v804_v1 = vadd.f32 %v4069_v41, %v803_v61 }
 0x20e   : > { %v876_v3 = vmul.f32 %v4071_v43, %v809_v60 }
 0x20f   : > { %3414 = vtanh.f32 %v890_v62  ;;  %v875_v4 = vmul.f32 %v4071_v43, %v804_v1  ;;  %v2749_v5 = vpop.f32.mrb[4].mxu1 }
 0x210   : > { %3416 = vtanh.f32 %v891_v54  ;;  %v893_v6 = vadd.f32 %v4074_v47, %v876_v3  ;;  %v819_v7 = vadd.f32 %v2749_v5, %v4069_v41  ;;  %v813_v9 = vpop.f32.mrb[5].mxu1 }
 0x211   : > { %v892_v53 = vadd.f32 %v4074_v47, %v875_v4  ;;  %v814_v10 = vadd.f32 %v4069_v41, %v813_v9 }
 0x212   : > { %v878_v12 = vmul.f32 %v4071_v43, %v819_v7 }
 0x213   : > { %3418 = vtanh.f32 %v892_v53  ;;  %v877_v13 = vmul.f32 %v4071_v43, %v814_v10  ;;  %v2752_v55 = vpop.f32.mrb[6].mxu1 }
 0x214   : > { %3420 = vtanh.f32 %v893_v6  ;;  %v895_v14 = vadd.f32 %v4074_v47, %v878_v12  ;;  %v829_v15 = vadd.f32 %v2752_v55, %v4069_v41  ;;  %v823_v17 = vpop.f32.mrb[7].mxu1 }
 0x215   : > { %v894_v58 = vadd.f32 %v4074_v47, %v877_v13  ;;  %v824_v18 = vadd.f32 %v4069_v41, %v823_v17 }
 0x216   : > { %v880_v20 = vmul.f32 %v4071_v43, %v829_v15 }
 0x217   : > { %3422 = vtanh.f32 %v894_v58  ;;  %v879_v21 = vmul.f32 %v4071_v43, %v824_v18  ;;  %v2755_v22 = vpop.f32.mrb[8].mxu1 }
 0x218   : > { %3424 = vtanh.f32 %v895_v14  ;;  %v897_v23 = vadd.f32 %v4074_v47, %v880_v20  ;;  %v839_v25 = vadd.f32 %v2755_v22, %v4069_v41  ;;  %v833_v26 = vpop.f32.mrb[9].mxu1 }
 0x219   : > { %v3415_v27 = vpop.eup %3414  ;;  %v896_v29 = vadd.f32 %v4074_v47, %v879_v21  ;;  %v834_v30 = vadd.f32 %v4069_v41, %v833_v26  ;;  %v2401_v26 = vld [vmem:[%s4768_s3 + $0xb8] sm:$0xff] }
 0x21a   : > { %v3417_v31 = vpop.eup %3416  ;;  %v882_v32 = vmul.f32 %v4071_v43, %v839_v25  ;;  %2797 = vmatprep.mubr.f32.mxu0 %v3415_v27 }
 0x21b   : > { %3426 = vtanh.f32 %v896_v29  ;;  %v881_v33 = vmul.f32 %v4071_v43, %v834_v30  ;;  %v2758_v35 = vpop.f32.mrb[10].mxu1  ;;  %2798 = vmatmul.mubr.f32.vlgmr.msra.gmra.mrb[16].mxu0 %v3417_v31  ;;  %v2402_v29 = vld [vmem:[%s4768_s3 + $0xc0] sm:$0xff]  ;;  %v2403_v30 = vld [vmem:[%s4768_s3 + $0xc8] sm:$0xff] }
 0x21c   : > { %3428 = vtanh.f32 %v897_v23  ;;  %v899_v36 = vadd.f32 %v4074_v47, %v882_v32  ;;  %v849_v37 = vadd.f32 %v2758_v35, %v4069_v41  ;;  %v843_v39 = vpop.f32.mrb[11].mxu1  ;;  %v3181_v31 = vpack.c.bf16 %v2403_v30, %v2402_v29  ;;  %v2404_v32 = vld [vmem:[%s4768_s3 + $0xd0] sm:$0xff] }
 0x21d   : > { %v3419_v40 = vpop.eup %3418  ;;  %v898_v42 = vadd.f32 %v4074_v47, %v881_v33  ;;  %v844_v45 = vadd.f32 %v4069_v41, %v843_v39  ;;  %v2405_v33 = vld [vmem:[%s4768_s3 + $0xd8] sm:$0xff] }
 0x21e   : > { %v3421_v46 = vpop.eup %3420  ;;  %v884_v49 = vmul.f32 %v4071_v43, %v849_v37  ;;  %2800 = vmatprep.mubr.f32.mxu0 %v3419_v40  ;;  %v3185_v35 = vpack.c.bf16 %v2405_v33, %v2404_v32  ;;  %v2407_v37 = vld [vmem:[%s4768_s3 + $0xe8] sm:$0xff]  ;;  %v2408_v40 = vld [vmem:[%s4768_s3 + $0xf0] sm:$0xff] }
 0x21f   : > { %3430 = vtanh.f32 %v898_v42  ;;  %v883_v50 = vmul.f32 %v4071_v43, %v844_v45  ;;  %v2761_v51 = vpop.f32.mrb[12].mxu1  ;;  %2801 = vmatmul.mubr.f32.gmra.mrb[18].mxu0 %v3421_v46  ;;  %v2409_v42 = vld [vmem:[%s4768_s3 + $0xf8] sm:$0xff]  ;;  %v1381_v46 = vld [vmem:[#allocation2 + $0x80] sm:$0xff] }
 0x220   : > { %3432 = vtanh.f32 %v899_v36  ;;  %v901_v52 = vadd.f32 %v4074_v47, %v884_v49  ;;  %v859_v54 = vadd.f32 %v2761_v51, %v4069_v41  ;;  %v853_v60 = vpop.f32.mrb[13].mxu1  ;;  %v2406_v36 = vld [vmem:[%s4768_s3 + $0xe0] sm:$0xff]  ;;  %v3193_v45 = vpack.c.bf16 %v2409_v42, %v2408_v40  ;;  %v1382_v49 = vld [vmem:[#allocation2 + $0x88] sm:$0xff] }
 0x221   : > { %v3423_v61 = vpop.eup %3422  ;;  %v900_v62 = vadd.f32 %v4074_v47, %v883_v50  ;;  %v854_v1 = vadd.f32 %v4069_v41, %v853_v60  ;;  %v3189_v39 = vpack.c.bf16 %v2407_v37, %v2406_v36  ;;  %v1383_v50 = vld [vmem:[#allocation2 + $0x90] sm:$0xff]  ;;  %v3197_v51 = vpack.c.bf16 %v1382_v49, %v1381_v46  ;;  %v1385_v60 = vld [vmem:[#allocation2 + $0xa0] sm:$0xff] }
 0x222   : > { %v3425_v3 = vpop.eup %3424  ;;  %v886_v4 = vmul.f32 %v4071_v43, %v859_v54  ;;  %2803 = vmatprep.mubr.f32.mxu0 %v3423_v61  ;;  %v1386_v61 = vld [vmem:[#allocation2 + $0xa8] sm:$0xff] }
 0x223   : > { %3434 = vtanh.f32 %v900_v62  ;;  %v885_v5 = vmul.f32 %v4071_v43, %v854_v1  ;;  %v2764_v6 = vpop.f32.mrb[14].mxu1  ;;  %2804 = vmatmul.mubr.f32.gmra.mrb[20].mxu0 %v3425_v3  ;;  %3198 = vmatprep.subr.bf16.mxu0 %v3197_v51  ;;  %v3205_v62 = vpack.c.bf16 %v1386_v61, %v1385_v60  ;;  %v1387_v1 = vld [vmem:[#allocation2 + $0xb0] sm:$0xff]  ;;  %v1388_v3 = vld [vmem:[#allocation2 + $0xb8] sm:$0xff] }
 0x224   : > { %3436 = vtanh.f32 %v901_v52  ;;  %v903_v7 = vadd.f32 %v4074_v47, %v886_v4  ;;  %v869_v9 = vadd.f32 %v2764_v6, %v4069_v41  ;;  %v863_v53 = vpop.f32.mrb[15].mxu1  ;;  %v1384_v52 = vld [vmem:[#allocation2 + $0x98] sm:$0xff]  ;;  %3200 = vmatpush3.bf16.msra.mxu0 %v3197_v51  ;;  %v3209_v4 = vpack.c.bf16 %v1388_v3, %v1387_v1 }
 0x225   : > { %v3427_v10 = vpop.eup %3426  ;;  %v902_v12 = vadd.f32 %v4074_v47, %v885_v5  ;;  %v864_v13 = vadd.f32 %v4069_v41, %v863_v53  ;;  %v3201_v54 = vpack.c.bf16 %v1384_v52, %v1383_v50  ;;  %v4156_v5 = vld [vmem:[%s4771_s6] ss:$0 sm:$0xff]  ;;  %v4159_v53 = vstv %s2390_s12  ;;  %s2392_s12 = sld [smem:[#allocation5 + $0x6]] }
 0x226   : > { %v3429_v55 = vpop.eup %3428  ;;  %v888_v14 = vmul.f32 %v4071_v43, %v869_v9  ;;  %2806 = vmatprep.mubr.f32.mxu0 %v3427_v10 }
 0x227   : > { %3438 = vtanh.f32 %v902_v12  ;;  %v887_v15 = vmul.f32 %v4071_v43, %v864_v13  ;;  %2807 = vmatmul.mubr.f32.gmra.mrb[22].mxu0 %v3429_v55  ;;  %3202 = vmatprep.subr.bf16.mxu0 %v3201_v54  ;;  %v4165_v13 = vstv %s2391_s19  ;;  %s2393_s19 = sld [smem:[#allocation5 + $0x7]] }
 0x228   : > { %3440 = vtanh.f32 %v903_v7  ;;  %v905_v17 = vadd.f32 %v4074_v47, %v888_v14  ;;  %3204 = vmatpush3.bf16.msra.mxu0 %v3201_v54 }
 0x229   : > { %v3431_v58 = vpop.eup %3430  ;;  %v904_v18 = vadd.f32 %v4074_v47, %v887_v15  ;;  %v2400_v47 = vld [vmem:[%s4768_s3 + $0xb0] sm:$0xff]  ;;  %3206 = vmatprep.subr.bf16.mxu0 %v3205_v62 }
 0x22a   : > { %v3433_v20 = vpop.eup %3432  ;;  %2809 = vmatprep.mubr.f32.mxu0 %v3431_v58  ;;  %v3177_v27 = vpack.c.bf16 %v2401_v26, %v2400_v47 }
 0x22b   : > { %3442 = vtanh.f32 %v904_v18  ;;  %2810 = vmatmul.mubr.f32.gmra.mrb[24].mxu0 %v3433_v20 }
 0x22c   : > { %3444 = vtanh.f32 %v905_v17  ;;  %3178 = vmatprep.subr.bf16.mxu1 %v3177_v27  ;;  %3208 = vmatpush3.bf16.msra.mxu0 %v3205_v62 }
 0x22d   : > { %v3435_v41 = vpop.eup %3434  ;;  %3180 = vmatpush3.bf16.msra.mxu1 %v3177_v27  ;;  %3210 = vmatprep.subr.bf16.mxu0 %v3209_v4 }
 0x22e   : > { %v3437_v21 = vpop.eup %3436  ;;  %2812 = vmatprep.mubr.f32.mxu0 %v3435_v41  ;;  %3182 = vmatprep.subr.bf16.mxu1 %v3181_v31 }
 0x22f   : > { %2813 = vmatmul.mubr.f32.gmra.mrb[26].mxu0 %v3437_v21 }
 0x230   : > { %3212 = vmatpush3.bf16.msra.mxu0 %v3209_v4 }
 0x231   : > { %v3439_v22 = vpop.eup %3438  ;;  %3184 = vmatpush3.bf16.msra.mxu1 %v3181_v31 }
 0x232   : > { %v3441_v23 = vpop.eup %3440  ;;  %2815 = vmatprep.mubr.f32.mxu0 %v3439_v22  ;;  %3186 = vmatprep.subr.bf16.mxu1 %v3185_v35 }
 0x233   : > { %2816 = vmatmul.mubr.f32.gmra.mrb[28].mxu0 %v3441_v23 }
 0x235   : > { %v3443_v43 = vpop.eup %3442  ;;  %3188 = vmatpush3.bf16.msra.mxu1 %v3185_v35 }
 0x236   : > { %v3445_v25 = vpop.eup %3444  ;;  %2818 = vmatprep.mubr.f32.mxu0 %v3443_v43  ;;  %3190 = vmatprep.subr.bf16.mxu1 %v3189_v39 }
 0x237   : > { %2819 = vmatmul.mubr.f32.gmra.mrb[30].mxu0 %v3445_v25 }
 0x239   : > { %3192 = vmatpush3.bf16.msra.mxu1 %v3189_v39 }
 0x23a   : > { %3194 = vmatprep.subr.bf16.mxu1 %v3193_v45 }
 0x23d   : > { %3196 = vmatpush3.bf16.msra.mxu1 %v3193_v45 }
 0x2ee   : > { %v2799_v6 = vpop.f32.mrb[16].mxu0 }
 0x2ef   : > { %v1017_v7 = vadd.f32 %v2799_v6, %v4156_v5  ;;  %v1011_v9 = vpop.f32.mrb[17].mxu0 }
 0x2f0   : > { %v1012_v10 = vadd.f32 %v4156_v5, %v1011_v9 }
 0x2f1   : > { %v4163_v12 = vadd.f32 %v1017_v7, %v3951_v56 }
 0x2f2   : > { %v4168_v55 = vadd.f32 %v1012_v10, %v3956_v59  ;;  %v2802_v14 = vpop.f32.mrb[18].mxu0 }
 0x2f3   : > { %v1112_v15 = vmul.f32 %v4159_v53, %v4163_v12  ;;  %v1027_v17 = vadd.f32 %v2802_v14, %v4156_v5  ;;  %v1021_v58 = vpop.f32.mrb[19].mxu0 }
 0x2f4   : > { %v1111_v18 = vmul.f32 %v4159_v53, %v4168_v55  ;;  %v1022_v20 = vadd.f32 %v4156_v5, %v1021_v58 }
 0x2f5   : > { %v1129_v56 = vadd.f32 %v4165_v13, %v1112_v15  ;;  %v4178_v41 = vadd.f32 %v1027_v17, %v3964_v0 }
 0x2f6   : > { %v1128_v59 = vadd.f32 %v4165_v13, %v1111_v18  ;;  %v4182_v21 = vadd.f32 %v1022_v20, %v3967_v2  ;;  %v2805_v22 = vpop.f32.mrb[20].mxu0 }
 0x2f7   : > { %v1114_v23 = vmul.f32 %v4159_v53, %v4178_v41  ;;  %v1037_v43 = vadd.f32 %v2805_v22, %v4156_v5  ;;  %v1031_v25 = vpop.f32.mrb[21].mxu0 }
 0x2f8   : > { %3446 = vtanh.f32 %v1128_v59  ;;  %v1113_v47 = vmul.f32 %v4159_v53, %v4182_v21  ;;  %v1032_v26 = vadd.f32 %v4156_v5, %v1031_v25 }
 0x2f9   : > { %3448 = vtanh.f32 %v1129_v56  ;;  %v1131_v0 = vadd.f32 %v4165_v13, %v1114_v23  ;;  %v4192_v27 = vadd.f32 %v1037_v43, %v3976_v8 }
 0x2fa   : > { %v1130_v2 = vadd.f32 %v4165_v13, %v1113_v47  ;;  %v4196_v29 = vadd.f32 %v1032_v26, %v3980_v11  ;;  %v2808_v30 = vpop.f32.mrb[22].mxu0 }
 0x2fb   : > { %v1116_v31 = vmul.f32 %v4159_v53, %v4192_v27  ;;  %v1047_v32 = vadd.f32 %v2808_v30, %v4156_v5  ;;  %v1041_v33 = vpop.f32.mrb[23].mxu0 }
 0x2fc   : > { %3450 = vtanh.f32 %v1130_v2  ;;  %v1115_v35 = vmul.f32 %v4159_v53, %v4196_v29  ;;  %v1042_v36 = vadd.f32 %v4156_v5, %v1041_v33 }
 0x2fd   : > { %3452 = vtanh.f32 %v1131_v0  ;;  %v1133_v8 = vadd.f32 %v4165_v13, %v1116_v31  ;;  %v4206_v37 = vadd.f32 %v1047_v32, %v3988_v16 }
 0x2fe   : > { %v1132_v11 = vadd.f32 %v4165_v13, %v1115_v35  ;;  %v4210_v39 = vadd.f32 %v1042_v36, %v3992_v19  ;;  %v2811_v40 = vpop.f32.mrb[24].mxu0 }
 0x2ff   : > { %v1118_v42 = vmul.f32 %v4159_v53, %v4206_v37  ;;  %v1057_v45 = vadd.f32 %v2811_v40, %v4156_v5  ;;  %v1051_v46 = vpop.f32.mrb[25].mxu0 }
 0x300   : > { %3454 = vtanh.f32 %v1132_v11  ;;  %v1117_v49 = vmul.f32 %v4159_v53, %v4210_v39  ;;  %v1052_v50 = vadd.f32 %v4156_v5, %v1051_v46 }
 0x301   : > { %3456 = vtanh.f32 %v1133_v8  ;;  %v1135_v16 = vadd.f32 %v4165_v13, %v1118_v42  ;;  %v4220_v51 = vadd.f32 %v1057_v45, %v4000_v24 }
 0x302   : > { %v3447_v19 = vpop.eup %3446  ;;  %v1134_v52 = vadd.f32 %v4165_v13, %v1117_v49  ;;  %v4224_v54 = vadd.f32 %v1052_v50, %v4004_v28  ;;  %v2814_v60 = vpop.f32.mrb[26].mxu0  ;;  %v1389_v50 = vld [vmem:[#allocation2 + $0xc0] sm:$0xff] }
 0x303   : > { %v3449_v61 = vpop.eup %3448  ;;  %v1120_v62 = vmul.f32 %v4159_v53, %v4220_v51  ;;  %v1067_v1 = vadd.f32 %v2814_v60, %v4156_v5  ;;  %v1061_v3 = vpop.f32.mrb[27].mxu0  ;;  %2853 = vmatprep.mubr.f32.mxu1 %v3447_v19  ;;  %v1391_v19 = vld [vmem:[#allocation2 + $0xd0] sm:$0xff] }
 0x304   : > { %3458 = vtanh.f32 %v1134_v52  ;;  %v1119_v24 = vmul.f32 %v4159_v53, %v4224_v54  ;;  %v1062_v4 = vadd.f32 %v4156_v5, %v1061_v3  ;;  %2854 = vmatmul.mubr.f32.vlgmr.msra.gmra.mrb[16].mxu1 %v3449_v61  ;;  %v1392_v52 = vld [vmem:[#allocation2 + $0xd8] sm:$0xff]  ;;  %v1393_v61 = vld [vmem:[#allocation2 + $0xe0] sm:$0xff]  ;;  %v1395_v3 = vld [vmem:[#allocation2 + $0xf0] sm:$0xff] }
 0x305   : > { %3460 = vtanh.f32 %v1135_v16  ;;  %v1137_v28 = vadd.f32 %v4165_v13, %v1120_v62  ;;  %v4234_v6 = vadd.f32 %v1067_v1, %v4012_v34  ;;  %v1390_v16 = vld [vmem:[#allocation2 + $0xc8] sm:$0xff]  ;;  %v3217_v60 = vpack.c.bf16 %v1392_v52, %v1391_v19 }
 0x306   : > { %v3451_v7 = vpop.eup %3450  ;;  %v1136_v9 = vadd.f32 %v4165_v13, %v1119_v24  ;;  %v4238_v10 = vadd.f32 %v1062_v4, %v4016_v38  ;;  %v2817_v14 = vpop.f32.mrb[28].mxu0  ;;  %v1394_v62 = vld [vmem:[#allocation2 + $0xe8] sm:$0xff]  ;;  %v1396_v24 = vld [vmem:[#allocation2 + $0xf8] sm:$0xff] }
 0x307   : > { %v3453_v15 = vpop.eup %3452  ;;  %v1122_v17 = vmul.f32 %v4159_v53, %v4234_v6  ;;  %v1077_v58 = vadd.f32 %v2817_v14, %v4156_v5  ;;  %v1071_v18 = vpop.f32.mrb[29].mxu0  ;;  %2856 = vmatprep.mubr.f32.mxu1 %v3451_v7  ;;  %v3221_v1 = vpack.c.bf16 %v1394_v62, %v1393_v61  ;;  %v3225_v4 = vpack.c.bf16 %v1396_v24, %v1395_v3  ;;  %v2419_v7 = vld [vmem:[%s4768_s3 + $0x108] sm:$0xff] }
 0x308   : > { %3462 = vtanh.f32 %v1136_v9  ;;  %v1121_v34 = vmul.f32 %v4159_v53, %v4238_v10  ;;  %v1072_v20 = vadd.f32 %v4156_v5, %v1071_v18  ;;  %2857 = vmatmul.mubr.f32.gmra.mrb[18].mxu1 %v3453_v15  ;;  %v2420_v9 = vld [vmem:[%s4768_s3 + $0x110] sm:$0xff]  ;;  %v2421_v15 = vld [vmem:[%s4768_s3 + $0x118] sm:$0xff]  ;;  %v2423_v18 = vld [vmem:[%s4768_s3 + $0x128] sm:$0xff] }
 0x309   : > { %3464 = vtanh.f32 %v1137_v28  ;;  %v1139_v38 = vadd.f32 %v4165_v13, %v1122_v17  ;;  %v4248_v56 = vadd.f32 %v1077_v58, %v4024_v44  ;;  %v2418_v28 = vld [vmem:[%s4768_s3 + $0x100] sm:$0xff]  ;;  %v3233_v17 = vpack.c.bf16 %v2421_v15, %v2420_v9 }
 0x30a   : > { %v3455_v59 = vpop.eup %3454  ;;  %v1138_v22 = vadd.f32 %v4165_v13, %v1121_v34  ;;  %v4252_v23 = vadd.f32 %v1072_v20, %v4028_v48  ;;  %v2820_v43 = vpop.f32.mrb[30].mxu0  ;;  %v3229_v14 = vpack.c.bf16 %v2419_v7, %v2418_v28  ;;  %v2422_v58 = vld [vmem:[%s4768_s3 + $0x120] sm:$0xff] }
 0x30b   : > { %v3457_v25 = vpop.eup %3456  ;;  %v1124_v47 = vmul.f32 %v4159_v53, %v4248_v56  ;;  %v1087_v26 = vadd.f32 %v2820_v43, %v4156_v5  ;;  %v1081_v0 = vpop.f32.mrb[31].mxu0  ;;  %2859 = vmatprep.mubr.f32.mxu1 %v3455_v59  ;;  %v3237_v34 = vpack.c.bf16 %v2423_v18, %v2422_v58  ;;  %v4295_v20 = vld [vmem:[%s4769_s4 + $0x1] ss:$0 sm:$0xff]  ;;  %v4297_v59 = vstv %s2392_s12 }
 0x30c   : > { %3466 = vtanh.f32 %v1138_v22  ;;  %v1123_v44 = vmul.f32 %v4159_v53, %v4252_v23  ;;  %v1082_v2 = vadd.f32 %v4156_v5, %v1081_v0  ;;  %2860 = vmatmul.mubr.f32.gmra.mrb[20].mxu1 %v3457_v25  ;;  %3230 = vmatprep.subr.bf16.mxu1 %v3229_v14  ;;  %v4300_v25 = vstv %s2393_s19 }
 0x30d   : > { %3468 = vtanh.f32 %v1139_v38  ;;  %v1141_v48 = vadd.f32 %v4165_v13, %v1124_v47  ;;  %v4262_v30 = vadd.f32 %v1087_v26, %v4036_v57  ;;  %3232 = vmatpush3.bf16.msra.mxu1 %v3229_v14 }
 0x30e   : > { %v3459_v31 = vpop.eup %3458  ;;  %v1140_v32 = vadd.f32 %v4165_v13, %v1123_v44  ;;  %v4266_v33 = vadd.f32 %v1082_v2, %v4040_v63  ;;  %3234 = vmatprep.subr.bf16.mxu1 %v3233_v17 }
 0x30f   : > { %v3461_v35 = vpop.eup %3460  ;;  %v1126_v36 = vmul.f32 %v4159_v53, %v4262_v30  ;;  %2862 = vmatprep.mubr.f32.mxu1 %v3459_v31 }
 0x310   : > { %3470 = vtanh.f32 %v1140_v32  ;;  %v1125_v5 = vmul.f32 %v4159_v53, %v4266_v33  ;;  %2863 = vmatmul.mubr.f32.gmra.mrb[22].mxu1 %v3461_v35 }
 0x311   : > { %3472 = vtanh.f32 %v1141_v48  ;;  %v1143_v57 = vadd.f32 %v4165_v13, %v1126_v36  ;;  %3236 = vmatpush3.bf16.msra.mxu1 %v3233_v17 }
 0x312   : > { %v3463_v8 = vpop.eup %3462  ;;  %v1142_v11 = vadd.f32 %v4165_v13, %v1125_v5  ;;  %v3213_v13 = vpack.c.bf16 %v1390_v16, %v1389_v50  ;;  %3238 = vmatprep.subr.bf16.mxu1 %v3237_v34 }
 0x313   : > { %v3465_v40 = vpop.eup %3464  ;;  %2865 = vmatprep.mubr.f32.mxu1 %v3463_v8 }
 0x314   : > { %3474 = vtanh.f32 %v1142_v11  ;;  %2866 = vmatmul.mubr.f32.gmra.mrb[24].mxu1 %v3465_v40  ;;  %3214 = vmatprep.subr.bf16.mxu0 %v3213_v13 }
 0x315   : > { %3476 = vtanh.f32 %v1143_v57  ;;  %3216 = vmatpush3.bf16.msra.mxu0 %v3213_v13  ;;  %3240 = vmatpush3.bf16.msra.mxu1 %v3237_v34 }
 0x316   : > { %v3467_v63 = vpop.eup %3466  ;;  %3218 = vmatprep.subr.bf16.mxu0 %v3217_v60 }
 0x317   : > { %v3469_v42 = vpop.eup %3468  ;;  %2868 = vmatprep.mubr.f32.mxu1 %v3467_v63 }
 0x318   : > { %2869 = vmatmul.mubr.f32.gmra.mrb[26].mxu1 %v3469_v42 }
 0x319   : > { %3220 = vmatpush3.bf16.msra.mxu0 %v3217_v60 }
 0x31a   : > { %v3471_v45 = vpop.eup %3470  ;;  %3222 = vmatprep.subr.bf16.mxu0 %v3221_v1 }
 0x31b   : > { %v3473_v46 = vpop.eup %3472  ;;  %2871 = vmatprep.mubr.f32.mxu1 %v3471_v45 }
 0x31c   : > { %2872 = vmatmul.mubr.f32.gmra.mrb[28].mxu1 %v3473_v46 }
 0x31d   : > { %3224 = vmatpush3.bf16.msra.mxu0 %v3221_v1 }
 0x31e   : > { %v3475_v53 = vpop.eup %3474  ;;  %3226 = vmatprep.subr.bf16.mxu0 %v3225_v4 }
 0x31f   : > { %v3477_v49 = vpop.eup %3476  ;;  %2874 = vmatprep.mubr.f32.mxu1 %v3475_v53 }
 0x320   : > { %2875 = vmatmul.mubr.f32.gmra.mrb[30].mxu1 %v3477_v49 }
 0x321   : > { %3228 = vmatpush3.bf16.msra.mxu0 %v3225_v4 }
 0x3d7   : > { %v2855_v38 = vpop.f32.mrb[16].mxu1 }
 0x3d8   : > { %v1257_v22 = vadd.f32 %v2855_v38, %v4295_v20  ;;  %v1251_v43 = vpop.f32.mrb[17].mxu1 }
 0x3d9   : > { %v1252_v47 = vadd.f32 %v4295_v20, %v1251_v43 }
 0x3da   : > { %v1332_v26 = vmul.f32 %v4297_v59, %v1257_v22 }
 0x3db   : > { %v1331_v0 = vmul.f32 %v4297_v59, %v1252_v47  ;;  %v2858_v44 = vpop.f32.mrb[18].mxu1 }
 0x3dc   : > { %v1349_v2 = vadd.f32 %v4300_v25, %v1332_v26  ;;  %v1267_v48 = vadd.f32 %v2858_v44, %v4295_v20  ;;  %v1261_v31 = vpop.f32.mrb[19].mxu1 }
 0x3dd   : > { %v1348_v32 = vadd.f32 %v4300_v25, %v1331_v0  ;;  %v1262_v35 = vadd.f32 %v4295_v20, %v1261_v31 }
 0x3de   : > { %v1334_v36 = vmul.f32 %v4297_v59, %v1267_v48 }
 0x3df   : > { %3478 = vtanh.f32 %v1348_v32  ;;  %v1333_v5 = vmul.f32 %v4297_v59, %v1262_v35  ;;  %v2861_v57 = vpop.f32.mrb[20].mxu1 }
 0x3e0   : > { %3480 = vtanh.f32 %v1349_v2  ;;  %v1351_v8 = vadd.f32 %v4300_v25, %v1334_v36  ;;  %v1277_v11 = vadd.f32 %v2861_v57, %v4295_v20  ;;  %v1271_v40 = vpop.f32.mrb[21].mxu1 }
 0x3e1   : > { %v1350_v63 = vadd.f32 %v4300_v25, %v1333_v5  ;;  %v1272_v42 = vadd.f32 %v4295_v20, %v1271_v40 }
 0x3e2   : > { %v1336_v45 = vmul.f32 %v4297_v59, %v1277_v11 }
 0x3e3   : > { %3482 = vtanh.f32 %v1350_v63  ;;  %v1335_v46 = vmul.f32 %v4297_v59, %v1272_v42  ;;  %v2864_v53 = vpop.f32.mrb[22].mxu1 }
 0x3e4   : > { %3484 = vtanh.f32 %v1351_v8  ;;  %v1353_v49 = vadd.f32 %v4300_v25, %v1336_v45  ;;  %v1287_v50 = vadd.f32 %v2864_v53, %v4295_v20  ;;  %v1281_v16 = vpop.f32.mrb[23].mxu1 }
 0x3e5   : > { %v1352_v13 = vadd.f32 %v4300_v25, %v1335_v46  ;;  %v1282_v19 = vadd.f32 %v4295_v20, %v1281_v16 }
 0x3e6   : > { %v1338_v52 = vmul.f32 %v4297_v59, %v1287_v50 }
 0x3e7   : > { %3486 = vtanh.f32 %v1352_v13  ;;  %v1337_v60 = vmul.f32 %v4297_v59, %v1282_v19  ;;  %v2867_v61 = vpop.f32.mrb[24].mxu1 }
 0x3e8   : > { %3488 = vtanh.f32 %v1353_v49  ;;  %v1355_v62 = vadd.f32 %v4300_v25, %v1338_v52  ;;  %v1297_v1 = vadd.f32 %v2867_v61, %v4295_v20  ;;  %v1291_v3 = vpop.f32.mrb[25].mxu1 }
 0x3e9   : > { %v3479_v24 = vpop.eup %3478  ;;  %v1354_v4 = vadd.f32 %v4300_v25, %v1337_v60  ;;  %v1292_v28 = vadd.f32 %v4295_v20, %v1291_v3  ;;  %v2425_v3 = vld [vmem:[%s4768_s3 + $0x138] sm:$0xff] }
 0x3ea   : > { %v3481_v7 = vpop.eup %3480  ;;  %v1340_v9 = vmul.f32 %v4297_v59, %v1297_v1  ;;  %2909 = vmatprep.mubr.f32.mxu0 %v3479_v24 }
 0x3eb   : > { %3490 = vtanh.f32 %v1354_v4  ;;  %v1339_v14 = vmul.f32 %v4297_v59, %v1292_v28  ;;  %v2870_v15 = vpop.f32.mrb[26].mxu1  ;;  %2910 = vmatmul.mubr.f32.vlgmr.msra.gmra.mrb[32].mxu0 %v3481_v7  ;;  %v2426_v4 = vld [vmem:[%s4768_s3 + $0x140] sm:$0xff]  ;;  %v2427_v28 = vld [vmem:[%s4768_s3 + $0x148] sm:$0xff] }
 0x3ec   : > { %3492 = vtanh.f32 %v1355_v62  ;;  %v1357_v17 = vadd.f32 %v4300_v25, %v1340_v9  ;;  %v1307_v58 = vadd.f32 %v2870_v15, %v4295_v20  ;;  %v1301_v18 = vpop.f32.mrb[27].mxu1  ;;  %v3245_v7 = vpack.c.bf16 %v2427_v28, %v2426_v4  ;;  %v2428_v9 = vld [vmem:[%s4768_s3 + $0x150] sm:$0xff] }
 0x3ed   : > { %v3483_v34 = vpop.eup %3482  ;;  %v1356_v38 = vadd.f32 %v4300_v25, %v1339_v14  ;;  %v1302_v22 = vadd.f32 %v4295_v20, %v1301_v18  ;;  %v2429_v14 = vld [vmem:[%s4768_s3 + $0x158] sm:$0xff] }
 0x3ee   : > { %v3485_v43 = vpop.eup %3484  ;;  %v1342_v47 = vmul.f32 %v4297_v59, %v1307_v58  ;;  %2912 = vmatprep.mubr.f32.mxu0 %v3483_v34  ;;  %v3249_v15 = vpack.c.bf16 %v2429_v14, %v2428_v9  ;;  %v2431_v58 = vld [vmem:[%s4768_s3 + $0x168] sm:$0xff]  ;;  %v2432_v34 = vld [vmem:[%s4768_s3 + $0x170] sm:$0xff] }
 0x3ef   : > { %3494 = vtanh.f32 %v1356_v38  ;;  %v1341_v26 = vmul.f32 %v4297_v59, %v1302_v22  ;;  %v2873_v0 = vpop.f32.mrb[28].mxu1  ;;  %2913 = vmatmul.mubr.f32.gmra.mrb[34].mxu0 %v3485_v43  ;;  %v2433_v38 = vld [vmem:[%s4768_s3 + $0x178] sm:$0xff]  ;;  %v1841_v43 = vld [vmem:[#allocation2 + $0x100] sm:$0xff] }
 0x3f0   : > { %3496 = vtanh.f32 %v1357_v17  ;;  %v1359_v44 = vadd.f32 %v4300_v25, %v1342_v47  ;;  %v1317_v2 = vadd.f32 %v2873_v0, %v4295_v20  ;;  %v1311_v48 = vpop.f32.mrb[29].mxu1  ;;  %v2430_v17 = vld [vmem:[%s4768_s3 + $0x160] sm:$0xff]  ;;  %v3257_v22 = vpack.c.bf16 %v2433_v38, %v2432_v34  ;;  %v1842_v47 = vld [vmem:[#allocation2 + $0x108] sm:$0xff] }
 0x3f1   : > { %v3487_v31 = vpop.eup %3486  ;;  %v1358_v32 = vadd.f32 %v4300_v25, %v1341_v26  ;;  %v1312_v35 = vadd.f32 %v4295_v20, %v1311_v48  ;;  %v3253_v18 = vpack.c.bf16 %v2431_v58, %v2430_v17  ;;  %v1843_v26 = vld [vmem:[#allocation2 + $0x110] sm:$0xff]  ;;  %v3261_v0 = vpack.c.bf16 %v1842_v47, %v1841_v43  ;;  %v1845_v48 = vld [vmem:[#allocation2 + $0x120] sm:$0xff] }
 0x3f2   : > { %v3489_v36 = vpop.eup %3488  ;;  %v1344_v5 = vmul.f32 %v4297_v59, %v1317_v2  ;;  %2915 = vmatprep.mubr.f32.mxu0 %v3487_v31  ;;  %v1846_v31 = vld [vmem:[#allocation2 + $0x128] sm:$0xff] }
 0x3f3   : > { %3498 = vtanh.f32 %v1358_v32  ;;  %v1343_v57 = vmul.f32 %v4297_v59, %v1312_v35  ;;  %v2876_v8 = vpop.f32.mrb[30].mxu1  ;;  %2916 = vmatmul.mubr.f32.gmra.mrb[36].mxu0 %v3489_v36  ;;  %3262 = vmatprep.subr.bf16.mxu0 %v3261_v0  ;;  %v3269_v32 = vpack.c.bf16 %v1846_v31, %v1845_v48  ;;  %v1847_v35 = vld [vmem:[#allocation2 + $0x130] sm:$0xff]  ;;  %v1848_v36 = vld [vmem:[#allocation2 + $0x138] sm:$0xff] }
 0x3f4   : > { %3500 = vtanh.f32 %v1359_v44  ;;  %v1361_v11 = vadd.f32 %v4300_v25, %v1344_v5  ;;  %v1327_v40 = vadd.f32 %v2876_v8, %v4295_v20  ;;  %v1321_v63 = vpop.f32.mrb[31].mxu1  ;;  %v1844_v44 = vld [vmem:[#allocation2 + $0x118] sm:$0xff]  ;;  %3264 = vmatpush3.bf16.msra.mxu0 %v3261_v0  ;;  %v3273_v5 = vpack.c.bf16 %v1848_v36, %v1847_v35 }
 0x3f5   : > { %v3491_v42 = vpop.eup %3490  ;;  %v1360_v45 = vadd.f32 %v4300_v25, %v1343_v57  ;;  %v1322_v46 = vadd.f32 %v4295_v20, %v1321_v63  ;;  %v3265_v2 = vpack.c.bf16 %v1844_v44, %v1843_v26  ;;  %v4382_v57 = vld [vmem:[%s4771_s6 + $0x1] ss:$0 sm:$0xff]  ;;  %v4385_v63 = vstv %s2414_s18  ;;  %s4683_s18 = scalar_lea.vmem %s4776_s11, %s2365_s13 }
 0x3f6   : > { %v3493_v53 = vpop.eup %3492  ;;  %v1346_v49 = vmul.f32 %v4297_v59, %v1327_v40  ;;  %2918 = vmatprep.mubr.f32.mxu0 %v3491_v42 }
 0x3f7   : > { %3502 = vtanh.f32 %v1360_v45  ;;  %v1345_v50 = vmul.f32 %v4297_v59, %v1322_v46  ;;  %2919 = vmatmul.mubr.f32.gmra.mrb[38].mxu0 %v3493_v53  ;;  %3266 = vmatprep.subr.bf16.mxu0 %v3265_v2  ;;  %v4391_v46 = vstv %s2415_s22 }
 0x3f8   : > { %3504 = vtanh.f32 %v1361_v11  ;;  %v1363_v16 = vadd.f32 %v4300_v25, %v1346_v49  ;;  %3268 = vmatpush3.bf16.msra.mxu0 %v3265_v2 }
 0x3f9   : > { %v3495_v13 = vpop.eup %3494  ;;  %v1362_v19 = vadd.f32 %v4300_v25, %v1345_v50  ;;  %v2424_v25 = vld [vmem:[%s4768_s3 + $0x130] sm:$0xff]  ;;  %3270 = vmatprep.subr.bf16.mxu0 %v3269_v32 }
 0x3fa   : > { %v3497_v52 = vpop.eup %3496  ;;  %2921 = vmatprep.mubr.f32.mxu0 %v3495_v13  ;;  %v3241_v24 = vpack.c.bf16 %v2425_v3, %v2424_v25 }
 0x3fb   : > { %3506 = vtanh.f32 %v1362_v19  ;;  %2922 = vmatmul.mubr.f32.gmra.mrb[40].mxu0 %v3497_v52 }
 0x3fc   : > { %3508 = vtanh.f32 %v1363_v16  ;;  %3242 = vmatprep.subr.bf16.mxu1 %v3241_v24  ;;  %3272 = vmatpush3.bf16.msra.mxu0 %v3269_v32 }
 0x3fd   : > { %v3499_v20 = vpop.eup %3498  ;;  %3244 = vmatpush3.bf16.msra.mxu1 %v3241_v24  ;;  %3274 = vmatprep.subr.bf16.mxu0 %v3273_v5 }
 0x3fe   : > { %v3501_v60 = vpop.eup %3500  ;;  %2924 = vmatprep.mubr.f32.mxu0 %v3499_v20  ;;  %3246 = vmatprep.subr.bf16.mxu1 %v3245_v7 }
 0x3ff   : > { %2925 = vmatmul.mubr.f32.gmra.mrb[42].mxu0 %v3501_v60 }
 0x400   : > { %3276 = vmatpush3.bf16.msra.mxu0 %v3273_v5 }
 0x401   : > { %v3503_v61 = vpop.eup %3502  ;;  %3248 = vmatpush3.bf16.msra.mxu1 %v3245_v7 }
 0x402   : > { %v3505_v62 = vpop.eup %3504  ;;  %2927 = vmatprep.mubr.f32.mxu0 %v3503_v61  ;;  %3250 = vmatprep.subr.bf16.mxu1 %v3249_v15 }
 0x403   : > { %2928 = vmatmul.mubr.f32.gmra.mrb[44].mxu0 %v3505_v62 }
 0x405   : > { %v3507_v59 = vpop.eup %3506  ;;  %3252 = vmatpush3.bf16.msra.mxu1 %v3249_v15 }
 0x406   : > { %v3509_v1 = vpop.eup %3508  ;;  %2930 = vmatprep.mubr.f32.mxu0 %v3507_v59  ;;  %3254 = vmatprep.subr.bf16.mxu1 %v3253_v18 }
 0x407   : > { %2931 = vmatmul.mubr.f32.gmra.mrb[46].mxu0 %v3509_v1 }
 0x409   : > { %3256 = vmatpush3.bf16.msra.mxu1 %v3253_v18 }
 0x40a   : > { %3258 = vmatprep.subr.bf16.mxu1 %v3257_v22 }
 0x40d   : > { %3260 = vmatpush3.bf16.msra.mxu1 %v3257_v22 }
 0x4be   : > { %v2911_v8 = vpop.f32.mrb[32].mxu0 }
 0x4bf   : > { %v1477_v11 = vadd.f32 %v2911_v8, %v4382_v57  ;;  %v1471_v40 = vpop.f32.mrb[33].mxu0 }
 0x4c0   : > { %v1472_v42 = vadd.f32 %v4382_v57, %v1471_v40 }
 0x4c1   : > { %v4389_v45 = vadd.f32 %v1477_v11, %v4163_v12 }
 0x4c2   : > { %v4394_v53 = vadd.f32 %v1472_v42, %v4168_v55  ;;  %v2914_v49 = vpop.f32.mrb[34].mxu0 }
 0x4c3   : > { %v1572_v50 = vmul.f32 %v4385_v63, %v4389_v45  ;;  %v1487_v16 = vadd.f32 %v2914_v49, %v4382_v57  ;;  %v1481_v13 = vpop.f32.mrb[35].mxu0 }
 0x4c4   : > { %v1571_v19 = vmul.f32 %v4385_v63, %v4394_v53  ;;  %v1482_v52 = vadd.f32 %v4382_v57, %v1481_v13 }
 0x4c5   : > { %v1589_v12 = vadd.f32 %v4391_v46, %v1572_v50  ;;  %v4404_v20 = vadd.f32 %v1487_v16, %v4178_v41 }
 0x4c6   : > { %v1588_v55 = vadd.f32 %v4391_v46, %v1571_v19  ;;  %v4408_v60 = vadd.f32 %v1482_v52, %v4182_v21  ;;  %v2917_v61 = vpop.f32.mrb[36].mxu0 }
 0x4c7   : > { %v1574_v62 = vmul.f32 %v4385_v63, %v4404_v20  ;;  %v1497_v59 = vadd.f32 %v2917_v61, %v4382_v57  ;;  %v1491_v1 = vpop.f32.mrb[37].mxu0 }
 0x4c8   : > { %3510 = vtanh.f32 %v1588_v55  ;;  %v1573_v25 = vmul.f32 %v4385_v63, %v4408_v60  ;;  %v1492_v3 = vadd.f32 %v4382_v57, %v1491_v1 }
 0x4c9   : > { %3512 = vtanh.f32 %v1589_v12  ;;  %v1591_v41 = vadd.f32 %v4391_v46, %v1574_v62  ;;  %v4418_v24 = vadd.f32 %v1497_v59, %v4192_v27 }
 0x4ca   : > { %v1590_v21 = vadd.f32 %v4391_v46, %v1573_v25  ;;  %v4422_v4 = vadd.f32 %v1492_v3, %v4196_v29  ;;  %v2920_v28 = vpop.f32.mrb[38].mxu0 }
 0x4cb   : > { %v1576_v7 = vmul.f32 %v4385_v63, %v4418_v24  ;;  %v1507_v9 = vadd.f32 %v2920_v28, %v4382_v57  ;;  %v1501_v14 = vpop.f32.mrb[39].mxu0 }
 0x4cc   : > { %3514 = vtanh.f32 %v1590_v21  ;;  %v1575_v15 = vmul.f32 %v4385_v63, %v4422_v4  ;;  %v1502_v17 = vadd.f32 %v4382_v57, %v1501_v14 }
 0x4cd   : > { %3516 = vtanh.f32 %v1591_v41  ;;  %v1593_v27 = vadd.f32 %v4391_v46, %v1576_v7  ;;  %v4432_v58 = vadd.f32 %v1507_v9, %v4206_v37 }
 0x4ce   : > { %v1592_v29 = vadd.f32 %v4391_v46, %v1575_v15  ;;  %v4436_v18 = vadd.f32 %v1502_v17, %v4210_v39  ;;  %v2923_v34 = vpop.f32.mrb[40].mxu0 }
 0x4cf   : > { %v1578_v38 = vmul.f32 %v4385_v63, %v4432_v58  ;;  %v1517_v22 = vadd.f32 %v2923_v34, %v4382_v57  ;;  %v1511_v43 = vpop.f32.mrb[41].mxu0 }
 0x4d0   : > { %3518 = vtanh.f32 %v1592_v29  ;;  %v1577_v47 = vmul.f32 %v4385_v63, %v4436_v18  ;;  %v1512_v26 = vadd.f32 %v4382_v57, %v1511_v43 }
 0x4d1   : > { %3520 = vtanh.f32 %v1593_v27  ;;  %v1595_v37 = vadd.f32 %v4391_v46, %v1578_v38  ;;  %v4446_v0 = vadd.f32 %v1517_v22, %v4220_v51 }
 0x4d2   : > { %v3511_v39 = vpop.eup %3510  ;;  %v1594_v44 = vadd.f32 %v4391_v46, %v1577_v47  ;;  %v4450_v2 = vadd.f32 %v1512_v26, %v4224_v54  ;;  %v2926_v48 = vpop.f32.mrb[42].mxu0  ;;  %v1849_v26 = vld [vmem:[#allocation2 + $0x140] sm:$0xff] }
 0x4d3   : > { %v3513_v31 = vpop.eup %3512  ;;  %v1580_v32 = vmul.f32 %v4385_v63, %v4446_v0  ;;  %v1527_v35 = vadd.f32 %v2926_v48, %v4382_v57  ;;  %v1521_v36 = vpop.f32.mrb[43].mxu0  ;;  %2965 = vmatprep.mubr.f32.mxu1 %v3511_v39  ;;  %v1851_v39 = vld [vmem:[#allocation2 + $0x150] sm:$0xff] }
 0x4d4   : > { %3522 = vtanh.f32 %v1594_v44  ;;  %v1579_v51 = vmul.f32 %v4385_v63, %v4450_v2  ;;  %v1522_v5 = vadd.f32 %v4382_v57, %v1521_v36  ;;  %2966 = vmatmul.mubr.f32.vlgmr.msra.gmra.mrb[32].mxu1 %v3513_v31  ;;  %v1852_v44 = vld [vmem:[#allocation2 + $0x158] sm:$0xff]  ;;  %v1853_v31 = vld [vmem:[#allocation2 + $0x160] sm:$0xff]  ;;  %v1855_v36 = vld [vmem:[#allocation2 + $0x170] sm:$0xff] }
 0x4d5   : > { %3524 = vtanh.f32 %v1595_v37  ;;  %v1597_v54 = vadd.f32 %v4391_v46, %v1580_v32  ;;  %v4460_v8 = vadd.f32 %v1527_v35, %v4234_v6  ;;  %v1850_v37 = vld [vmem:[#allocation2 + $0x148] sm:$0xff]  ;;  %v3281_v48 = vpack.c.bf16 %v1852_v44, %v1851_v39 }
 0x4d6   : > { %v3515_v11 = vpop.eup %3514  ;;  %v1596_v40 = vadd.f32 %v4391_v46, %v1579_v51  ;;  %v4464_v42 = vadd.f32 %v1522_v5, %v4238_v10  ;;  %v2929_v49 = vpop.f32.mrb[44].mxu0  ;;  %v1854_v32 = vld [vmem:[#allocation2 + $0x168] sm:$0xff]  ;;  %v1856_v51 = vld [vmem:[#allocation2 + $0x178] sm:$0xff] }
 0x4d7   : > { %v3517_v50 = vpop.eup %3516  ;;  %v1582_v16 = vmul.f32 %v4385_v63, %v4460_v8  ;;  %v1537_v13 = vadd.f32 %v2929_v49, %v4382_v57  ;;  %v1531_v19 = vpop.f32.mrb[45].mxu0  ;;  %2968 = vmatprep.mubr.f32.mxu1 %v3515_v11  ;;  %v3285_v35 = vpack.c.bf16 %v1854_v32, %v1853_v31  ;;  %v3289_v5 = vpack.c.bf16 %v1856_v51, %v1855_v36  ;;  %v2043_v11 = vld [vmem:[%s4773_s8 + $0x8] sm:$0xff] }
 0x4d8   : > { %3526 = vtanh.f32 %v1596_v40  ;;  %v1581_v6 = vmul.f32 %v4385_v63, %v4464_v42  ;;  %v1532_v52 = vadd.f32 %v4382_v57, %v1531_v19  ;;  %2969 = vmatmul.mubr.f32.gmra.mrb[34].mxu1 %v3517_v50  ;;  %v2044_v40 = vld [vmem:[%s4773_s8 + $0x10] sm:$0xff]  ;;  %v2045_v50 = vld [vmem:[%s4773_s8 + $0x18] sm:$0xff]  ;;  %v2047_v19 = vld [vmem:[%s4773_s8 + $0x28] sm:$0xff] }
 0x4d9   : > { %3528 = vtanh.f32 %v1597_v54  ;;  %v1599_v10 = vadd.f32 %v4391_v46, %v1582_v16  ;;  %v4474_v12 = vadd.f32 %v1537_v13, %v4248_v56  ;;  %v2042_v54 = vld [vmem:[%s4773_s8] sm:$0xff]  ;;  %v4515_v16 = vpack.c.bf16 %v2045_v50, %v2044_v40 }
 0x4da   : > { %v3519_v55 = vpop.eup %3518  ;;  %v1598_v61 = vadd.f32 %v4391_v46, %v1581_v6  ;;  %v4478_v62 = vadd.f32 %v1532_v52, %v4252_v23  ;;  %v2932_v59 = vpop.f32.mrb[46].mxu0  ;;  %v4509_v49 = vpack.c.bf16 %v2043_v11, %v2042_v54  ;;  %v2046_v13 = vld [vmem:[%s4773_s8 + $0x20] sm:$0xff]  ;;  %v2048_v52 = vld [vmem:[%s4773_s8 + $0x30] sm:$0xff] }
 0x4db   : > { %v3521_v1 = vpop.eup %3520  ;;  %v1584_v25 = vmul.f32 %v4385_v63, %v4474_v12  ;;  %v1547_v3 = vadd.f32 %v2932_v59, %v4382_v57  ;;  %v1541_v41 = vpop.f32.mrb[47].mxu0  ;;  %2971 = vmatprep.mubr.f32.mxu1 %v3519_v55  ;;  %v4526_v6 = vpack.c.bf16 %v2047_v19, %v2046_v13 }
 0x4dc   : > { %3530 = vtanh.f32 %v1598_v61  ;;  %v1583_v56 = vmul.f32 %v4385_v63, %v4478_v62  ;;  %v1542_v21 = vadd.f32 %v4382_v57, %v1541_v41  ;;  %2972 = vmatmul.mubr.f32.gmra.mrb[36].mxu1 %v3521_v1  ;;  %3325 = vmatprep.subr.bf16.mxu1 %v4509_v49  ;;  %v4544_v61 = vld [vmem:[%s4769_s4 + $0x2] ss:$0 sm:$0xff]  ;;  %v4546_v1 = vstv %s2416_s26 }
 0x4dd   : > { %3532 = vtanh.f32 %v1599_v10  ;;  %v1601_v23 = vadd.f32 %v4391_v46, %v1584_v25  ;;  %v4488_v28 = vadd.f32 %v1547_v3, %v4262_v30  ;;  %3333 = vmatpush3.bf16.msra.mxu1 %v4509_v49  ;;  %v2049_v10 = vld [vmem:[%s4773_s8 + $0x38] sm:$0xff]  ;;  %v4549_v41 = vstv %s2417_s20 }
 0x4de   : > { %v3523_v7 = vpop.eup %3522  ;;  %v1600_v9 = vadd.f32 %v4391_v46, %v1583_v56  ;;  %v4492_v14 = vadd.f32 %v1542_v21, %v4266_v33  ;;  %3326 = vmatprep.subr.bf16.mxu1 %v4515_v16  ;;  %v4536_v55 = vpack.c.bf16 %v2049_v10, %v2048_v52 }
 0x4df   : > { %v3525_v15 = vpop.eup %3524  ;;  %v1586_v17 = vmul.f32 %v4385_v63, %v4488_v28  ;;  %2974 = vmatprep.mubr.f32.mxu1 %v3523_v7 }
 0x4e0   : > { %3534 = vtanh.f32 %v1600_v9  ;;  %v1585_v57 = vmul.f32 %v4385_v63, %v4492_v14  ;;  %2975 = vmatmul.mubr.f32.gmra.mrb[38].mxu1 %v3525_v15 }
 0x4e1   : > { %3536 = vtanh.f32 %v1601_v23  ;;  %v1603_v30 = vadd.f32 %v4391_v46, %v1586_v17  ;;  %3334 = vmatpush3.bf16.msra.mxu1 %v4515_v16 }
 0x4e2   : > { %v3527_v27 = vpop.eup %3526  ;;  %v1602_v29 = vadd.f32 %v4391_v46, %v1585_v57  ;;  %v3277_v46 = vpack.c.bf16 %v1850_v37, %v1849_v26  ;;  %3327 = vmatprep.subr.bf16.mxu1 %v4526_v6 }
 0x4e3   : > { %v3529_v34 = vpop.eup %3528  ;;  %2977 = vmatprep.mubr.f32.mxu1 %v3527_v27 }
 0x4e4   : > { %3538 = vtanh.f32 %v1602_v29  ;;  %2978 = vmatmul.mubr.f32.gmra.mrb[40].mxu1 %v3529_v34  ;;  %3278 = vmatprep.subr.bf16.mxu0 %v3277_v46 }
 0x4e5   : > { %3540 = vtanh.f32 %v1603_v30  ;;  %3280 = vmatpush3.bf16.msra.mxu0 %v3277_v46  ;;  %3335 = vmatpush3.bf16.msra.mxu1 %v4526_v6 }
 0x4e6   : > { %v3531_v33 = vpop.eup %3530  ;;  %3282 = vmatprep.subr.bf16.mxu0 %v3281_v48  ;;  %3328 = vmatprep.subr.bf16.mxu1 %v4536_v55 }
 0x4e7   : > { %v3533_v38 = vpop.eup %3532  ;;  %2980 = vmatprep.mubr.f32.mxu1 %v3531_v33 }
 0x4e8   : > { %2981 = vmatmul.mubr.f32.gmra.mrb[42].mxu1 %v3533_v38 }
 0x4e9   : > { %3284 = vmatpush3.bf16.msra.mxu0 %v3281_v48  ;;  %3336 = vmatpush3.bf16.msra.mxu1 %v4536_v55 }
 0x4ea   : > { %v3535_v22 = vpop.eup %3534  ;;  %3286 = vmatprep.subr.bf16.mxu0 %v3285_v35 }
 0x4eb   : > { %v3537_v43 = vpop.eup %3536  ;;  %2983 = vmatprep.mubr.f32.mxu1 %v3535_v22 }
 0x4ec   : > { %2984 = vmatmul.mubr.f32.gmra.mrb[44].mxu1 %v3537_v43 }
 0x4ed   : > { %3288 = vmatpush3.bf16.msra.mxu0 %v3285_v35 }
 0x4ee   : > { %v3539_v63 = vpop.eup %3538  ;;  %3290 = vmatprep.subr.bf16.mxu0 %v3289_v5 }
 0x4ef   : > { %v3541_v47 = vpop.eup %3540  ;;  %2986 = vmatprep.mubr.f32.mxu1 %v3539_v63 }
 0x4f0   : > { %2987 = vmatmul.mubr.f32.gmra.mrb[46].mxu1 %v3541_v47 }
 0x4f1   : > { %3292 = vmatpush3.bf16.msra.mxu0 %v3289_v5 }
 0x4f2   : > { %3294 = vmatprep.subr.bf16.mxu0 %v4509_v49 }
 0x5a7   : > { %v2967_v59 = vpop.f32.mrb[32].mxu1 }
 0x5a8   : > { %v1717_v25 = vadd.f32 %v2967_v59, %v4544_v61  ;;  %v1711_v3 = vpop.f32.mrb[33].mxu1 }
 0x5a9   : > { %v1712_v56 = vadd.f32 %v4544_v61, %v1711_v3 }
 0x5aa   : > { %v1792_v21 = vmul.f32 %v4546_v1, %v1717_v25 }
 0x5ab   : > { %v1791_v23 = vmul.f32 %v4546_v1, %v1712_v56  ;;  %v2970_v7 = vpop.f32.mrb[34].mxu1 }
 0x5ac   : > { %v1809_v9 = vadd.f32 %v4549_v41, %v1792_v21  ;;  %v1727_v15 = vadd.f32 %v2970_v7, %v4544_v61  ;;  %v1721_v17 = vpop.f32.mrb[35].mxu1 }
 0x5ad   : > { %v1808_v57 = vadd.f32 %v4549_v41, %v1791_v23  ;;  %v1722_v30 = vadd.f32 %v4544_v61, %v1721_v17 }
 0x5ae   : > { %v1794_v27 = vmul.f32 %v4546_v1, %v1727_v15 }
 0x5af   : > { %3542 = vtanh.f32 %v1808_v57  ;;  %v1793_v29 = vmul.f32 %v4546_v1, %v1722_v30  ;;  %v2973_v34 = vpop.f32.mrb[36].mxu1 }
 0x5b0   : > { %3544 = vtanh.f32 %v1809_v9  ;;  %v1811_v33 = vadd.f32 %v4549_v41, %v1794_v27  ;;  %v1737_v38 = vadd.f32 %v2973_v34, %v4544_v61  ;;  %v1731_v22 = vpop.f32.mrb[37].mxu1 }
 0x5b1   : > { %v1810_v43 = vadd.f32 %v4549_v41, %v1793_v29  ;;  %v1732_v63 = vadd.f32 %v4544_v61, %v1731_v22 }
 0x5b2   : > { %v1796_v47 = vmul.f32 %v4546_v1, %v1737_v38 }
 0x5b3   : > { %3546 = vtanh.f32 %v1810_v43  ;;  %v1795_v26 = vmul.f32 %v4546_v1, %v1732_v63  ;;  %v2976_v37 = vpop.f32.mrb[38].mxu1 }
 0x5b4   : > { %3548 = vtanh.f32 %v1811_v33  ;;  %v1813_v46 = vadd.f32 %v4549_v41, %v1796_v47  ;;  %v1747_v39 = vadd.f32 %v2976_v37, %v4544_v61  ;;  %v1741_v44 = vpop.f32.mrb[39].mxu1 }
 0x5b5   : > { %v1812_v48 = vadd.f32 %v4549_v41, %v1795_v26  ;;  %v1742_v31 = vadd.f32 %v4544_v61, %v1741_v44 }
 0x5b6   : > { %v1798_v32 = vmul.f32 %v4546_v1, %v1747_v39 }
 0x5b7   : > { %3550 = vtanh.f32 %v1812_v48  ;;  %v1797_v35 = vmul.f32 %v4546_v1, %v1742_v31  ;;  %v2979_v36 = vpop.f32.mrb[40].mxu1 }
 0x5b8   : > { %3552 = vtanh.f32 %v1813_v46  ;;  %v1815_v51 = vadd.f32 %v4549_v41, %v1798_v32  ;;  %v1757_v5 = vadd.f32 %v2979_v36, %v4544_v61  ;;  %v1751_v54 = vpop.f32.mrb[41].mxu1 }
 0x5b9   : > { %v3543_v11 = vpop.eup %3542  ;;  %v1814_v40 = vadd.f32 %v4549_v41, %v1797_v35  ;;  %v1752_v50 = vadd.f32 %v4544_v61, %v1751_v54 }
 0x5ba   : > { %v3545_v13 = vpop.eup %3544  ;;  %v1800_v19 = vmul.f32 %v4546_v1, %v1757_v5  ;;  %3021 = vmatprep.mubr.f32.mxu0 %v3543_v11 }
 0x5bb   : > { %3554 = vtanh.f32 %v1814_v40  ;;  %v1799_v52 = vmul.f32 %v4546_v1, %v1752_v50  ;;  %v2982_v10 = vpop.f32.mrb[42].mxu1  ;;  %3022 = vmatmul.mubr.f32.vlgmr.msra.gmra.mrb[48].mxu0 %v3545_v13  ;;  %v2052_v40 = vld [vmem:[%s4773_s8 + $0x50] sm:$0xff]  ;;  %v2053_v50 = vld [vmem:[%s4773_s8 + $0x58] sm:$0xff] }
 0x5bc   : > { %3556 = vtanh.f32 %v1815_v51  ;;  %v1817_v59 = vadd.f32 %v4549_v41, %v1800_v19  ;;  %v1767_v25 = vadd.f32 %v2982_v10, %v4544_v61  ;;  %v1761_v3 = vpop.f32.mrb[43].mxu1  ;;  %3296 = vmatpush3.bf16.msra.mxu0 %v4509_v49  ;;  %v3313_v13 = vpack.c.bf16 %v2053_v50, %v2052_v40  ;;  %v2054_v19 = vld [vmem:[%s4773_s8 + $0x60] sm:$0xff] }
 0x5bd   : > { %v3547_v56 = vpop.eup %3546  ;;  %v1816_v21 = vadd.f32 %v4549_v41, %v1799_v52  ;;  %v1762_v23 = vadd.f32 %v4544_v61, %v1761_v3  ;;  %3298 = vmatprep.subr.bf16.mxu0 %v4515_v16  ;;  %v2055_v52 = vld [vmem:[%s4773_s8 + $0x68] sm:$0xff] }
 0x5be   : > { %v3549_v7 = vpop.eup %3548  ;;  %v1802_v9 = vmul.f32 %v4546_v1, %v1767_v25  ;;  %3024 = vmatprep.mubr.f32.mxu0 %v3547_v56  ;;  %v3317_v10 = vpack.c.bf16 %v2055_v52, %v2054_v19  ;;  %v2057_v25 = vld [vmem:[%s4773_s8 + $0x78] sm:$0xff]  ;;  %v4632_v56 = vld [vmem:[%s4771_s6 + $0x2] ss:$0 sm:$0xff] }
 0x5bf   : > { %3558 = vtanh.f32 %v1816_v21  ;;  %v1801_v15 = vmul.f32 %v4546_v1, %v1762_v23  ;;  %v2985_v17 = vpop.f32.mrb[44].mxu1  ;;  %3025 = vmatmul.mubr.f32.gmra.mrb[50].mxu0 %v3549_v7 }
 0x5c0   : > { %3560 = vtanh.f32 %v1817_v59  ;;  %v1819_v57 = vadd.f32 %v4549_v41, %v1802_v9  ;;  %v1777_v49 = vadd.f32 %v2985_v17, %v4544_v61  ;;  %v1771_v30 = vpop.f32.mrb[45].mxu1  ;;  %3300 = vmatpush3.bf16.msra.mxu0 %v4515_v16  ;;  %v2056_v59 = vld [vmem:[%s4773_s8 + $0x70] sm:$0xff] }
 0x5c1   : > { %v3551_v27 = vpop.eup %3550  ;;  %v1818_v29 = vadd.f32 %v4549_v41, %v1801_v15  ;;  %v1772_v34 = vadd.f32 %v4544_v61, %v1771_v30  ;;  %3302 = vmatprep.subr.bf16.mxu0 %v4526_v6  ;;  %v3321_v3 = vpack.c.bf16 %v2057_v25, %v2056_v59 }
 0x5c2   : > { %v3553_v33 = vpop.eup %3552  ;;  %v1804_v38 = vmul.f32 %v4546_v1, %v1777_v49  ;;  %3027 = vmatprep.mubr.f32.mxu0 %v3551_v27 }
 0x5c3   : > { %3562 = vtanh.f32 %v1818_v29  ;;  %v1803_v22 = vmul.f32 %v4546_v1, %v1772_v34  ;;  %v2988_v43 = vpop.f32.mrb[46].mxu1  ;;  %3028 = vmatmul.mubr.f32.gmra.mrb[52].mxu0 %v3553_v33 }
 0x5c4   : > { %3564 = vtanh.f32 %v1819_v57  ;;  %v1821_v63 = vadd.f32 %v4549_v41, %v1804_v38  ;;  %v1787_v16 = vadd.f32 %v2988_v43, %v4544_v61  ;;  %v1781_v47 = vpop.f32.mrb[47].mxu1  ;;  %3304 = vmatpush3.bf16.msra.mxu0 %v4526_v6 }
 0x5c5   : > { %v3555_v26 = vpop.eup %3554  ;;  %v1820_v37 = vadd.f32 %v4549_v41, %v1803_v22  ;;  %v1782_v46 = vadd.f32 %v4544_v61, %v1781_v47  ;;  %3306 = vmatprep.subr.bf16.mxu0 %v4536_v55 }
 0x5c6   : > { %v3557_v39 = vpop.eup %3556  ;;  %v1806_v44 = vmul.f32 %v4546_v1, %v1787_v16  ;;  %3030 = vmatprep.mubr.f32.mxu0 %v3555_v26 }
 0x5c7   : > { %3566 = vtanh.f32 %v1820_v37  ;;  %v1805_v48 = vmul.f32 %v4546_v1, %v1782_v46  ;;  %3031 = vmatmul.mubr.f32.gmra.mrb[54].mxu0 %v3557_v39 }
 0x5c8   : > { %3568 = vtanh.f32 %v1821_v63  ;;  %v1823_v31 = vadd.f32 %v4549_v41, %v1806_v44  ;;  %3308 = vmatpush3.bf16.msra.mxu0 %v4536_v55  ;;  %v2050_v55 = vld [vmem:[%s4773_s8 + $0x40] sm:$0xff] }
 0x5c9   : > { %v3559_v6 = vpop.eup %3558  ;;  %v1822_v32 = vadd.f32 %v4549_v41, %v1805_v48  ;;  %v2051_v41 = vld [vmem:[%s4773_s8 + $0x48] sm:$0xff] }
 0x5ca   : > { %v3561_v35 = vpop.eup %3560  ;;  %3033 = vmatprep.mubr.f32.mxu0 %v3559_v6  ;;  %v3309_v11 = vpack.c.bf16 %v2051_v41, %v2050_v55 }
 0x5cb   : > { %3570 = vtanh.f32 %v1822_v32  ;;  %3034 = vmatmul.mubr.f32.gmra.mrb[56].mxu0 %v3561_v35 }
 0x5cc   : > { %3572 = vtanh.f32 %v1823_v31  ;;  %3310 = vmatprep.subr.bf16.mxu0 %v3309_v11  ;;  %3329 = vmatprep.subr.bf16.mxu1 %v3309_v11 }
 0x5cd   : > { %v3563_v61 = vpop.eup %3562  ;;  %3312 = vmatpush3.bf16.msra.mxu0 %v3309_v11  ;;  %3337 = vmatpush3.bf16.msra.mxu1 %v3309_v11 }
 0x5ce   : > { %v3565_v36 = vpop.eup %3564  ;;  %3036 = vmatprep.mubr.f32.mxu0 %v3563_v61  ;;  %3314 = vmatprep.subr.bf16.mxu0 %v3313_v13 }
 0x5cf   : > { %3037 = vmatmul.mubr.f32.gmra.mrb[58].mxu0 %v3565_v36  ;;  %3330 = vmatprep.subr.bf16.mxu1 %v3313_v13 }
 0x5d1   : > { %v3567_v51 = vpop.eup %3566  ;;  %3316 = vmatpush3.bf16.msra.mxu0 %v3313_v13  ;;  %3338 = vmatpush3.bf16.msra.mxu1 %v3313_v13 }
 0x5d2   : > { %v3569_v1 = vpop.eup %3568  ;;  %3039 = vmatprep.mubr.f32.mxu0 %v3567_v51  ;;  %3318 = vmatprep.subr.bf16.mxu0 %v3317_v10 }
 0x5d3   : > { %3040 = vmatmul.mubr.f32.gmra.mrb[60].mxu0 %v3569_v1  ;;  %3331 = vmatprep.subr.bf16.mxu1 %v3317_v10 }
 0x5d5   : > { %v3571_v5 = vpop.eup %3570  ;;  %3320 = vmatpush3.bf16.msra.mxu0 %v3317_v10  ;;  %3339 = vmatpush3.bf16.msra.mxu1 %v3317_v10 }
 0x5d6   : > { %v3573_v54 = vpop.eup %3572  ;;  %3042 = vmatprep.mubr.f32.mxu0 %v3571_v5  ;;  %3322 = vmatprep.subr.bf16.mxu0 %v3321_v3 }
 0x5d7   : > { %3043 = vmatmul.mubr.f32.gmra.mrb[62].mxu0 %v3573_v54  ;;  %3332 = vmatprep.subr.bf16.mxu1 %v3321_v3 }
 0x5d9   : > { %3324 = vmatpush3.bf16.msra.mxu0 %v3321_v3  ;;  %3340 = vmatpush3.bf16.msra.mxu1 %v3321_v3 }
 0x68e   : > { %v3023_v21 = vpop.f32.mrb[48].mxu0 }
 0x68f   : > { %v1937_v23 = vadd.f32 %v3023_v21, %v4632_v56  ;;  %v1931_v7 = vpop.f32.mrb[49].mxu0 }
 0x690   : > { %v1932_v9 = vadd.f32 %v4632_v56, %v1931_v7  ;;  %v4671_v7 = vstv %s2210_s14 }
 0x691   : > { %v2011_v15 = vadd.f32 %v1937_v23, %v4389_v45 }
 0x692   : > { %v2010_v17 = vadd.f32 %v1932_v9, %v4394_v53  ;;  %v3026_v57 = vpop.f32.mrb[50].mxu0 }
 0x693   : > { %v1947_v49 = vadd.f32 %v3026_v57, %v4632_v56  ;;  %v1941_v30 = vpop.f32.mrb[51].mxu0 }
 0x694   : > { %3574 = vtanh.f32 %v2010_v17  ;;  %v1942_v27 = vadd.f32 %v4632_v56, %v1941_v30  ;;  %v4674_v17 = vstv %s2439_s21 }
 0x695   : > { %3576 = vtanh.f32 %v2011_v15  ;;  %v2013_v29 = vadd.f32 %v1947_v49, %v4404_v20 }
 0x696   : > { %v2012_v34 = vadd.f32 %v1942_v27, %v4408_v60  ;;  %v3029_v33 = vpop.f32.mrb[52].mxu0 }
 0x697   : > { %v1957_v38 = vadd.f32 %v3029_v33, %v4632_v56  ;;  %v1951_v22 = vpop.f32.mrb[53].mxu0 }
 0x698   : > { %3578 = vtanh.f32 %v2012_v34  ;;  %v1952_v45 = vadd.f32 %v4632_v56, %v1951_v22 }
 0x699   : > { %3580 = vtanh.f32 %v2013_v29  ;;  %v2015_v53 = vadd.f32 %v1957_v38, %v4418_v24 }
 0x69a   : > { %v2014_v43 = vadd.f32 %v1952_v45, %v4422_v4  ;;  %v3032_v63 = vpop.f32.mrb[54].mxu0 }
 0x69b   : > { %v1967_v16 = vadd.f32 %v3032_v63, %v4632_v56  ;;  %v1961_v47 = vpop.f32.mrb[55].mxu0 }
 0x69c   : > { %3582 = vtanh.f32 %v2014_v43  ;;  %v1962_v20 = vadd.f32 %v4632_v56, %v1961_v47 }
 0x69d   : > { %3584 = vtanh.f32 %v2015_v53  ;;  %v2017_v60 = vadd.f32 %v1967_v16, %v4432_v58 }
 0x69e   : > { %v3575_v26 = vpop.eup %3574  ;;  %v2016_v37 = vadd.f32 %v1962_v20, %v4436_v18  ;;  %v3035_v46 = vpop.f32.mrb[56].mxu0 }
 0x69f   : > { %v3577_v39 = vpop.eup %3576  ;;  %v1977_v44 = vadd.f32 %v3035_v46, %v4632_v56  ;;  %v1971_v24 = vpop.f32.mrb[57].mxu0  ;;  %3077 = vmatprep.mubr.f32.mxu0 %v3575_v26 }
 0x6a0   : > { %3586 = vtanh.f32 %v2016_v37  ;;  %v1972_v4 = vadd.f32 %v4632_v56, %v1971_v24  ;;  %3078 = vmatmul.mubr.f32.vlgmr.msra.gmra.mrb[64].mxu0 %v3577_v39 }
 0x6a1   : > { %3588 = vtanh.f32 %v2017_v60  ;;  %v2019_v48 = vadd.f32 %v1977_v44, %v4446_v0 }
 0x6a2   : > { %v3579_v31 = vpop.eup %3578  ;;  %v2018_v6 = vadd.f32 %v1972_v4, %v4450_v2  ;;  %v3038_v58 = vpop.f32.mrb[58].mxu0 }
 0x6a3   : > { %v3581_v32 = vpop.eup %3580  ;;  %v1987_v18 = vadd.f32 %v3038_v58, %v4632_v56  ;;  %v1981_v35 = vpop.f32.mrb[59].mxu0  ;;  %3080 = vmatprep.mubr.f32.mxu0 %v3579_v31 }
 0x6a4   : > { %3590 = vtanh.f32 %v2018_v6  ;;  %v1982_v61 = vadd.f32 %v4632_v56, %v1981_v35  ;;  %3081 = vmatmul.mubr.f32.gmra.mrb[66].mxu0 %v3581_v32 }
 0x6a5   : > { %3592 = vtanh.f32 %v2019_v48  ;;  %v2021_v36 = vadd.f32 %v1987_v18, %v4460_v8 }
 0x6a6   : > { %v3583_v51 = vpop.eup %3582  ;;  %v2020_v1 = vadd.f32 %v1982_v61, %v4464_v42  ;;  %v3041_v0 = vpop.f32.mrb[60].mxu0 }
 0x6a7   : > { %v3585_v5 = vpop.eup %3584  ;;  %v1997_v2 = vadd.f32 %v3041_v0, %v4632_v56  ;;  %v1991_v54 = vpop.f32.mrb[61].mxu0  ;;  %3083 = vmatprep.mubr.f32.mxu0 %v3583_v51 }
 0x6a8   : > { %3594 = vtanh.f32 %v2020_v1  ;;  %v1992_v55 = vadd.f32 %v4632_v56, %v1991_v54  ;;  %3084 = vmatmul.mubr.f32.gmra.mrb[68].mxu0 %v3585_v5 }
 0x6a9   : > { %3596 = vtanh.f32 %v2021_v36  ;;  %v2023_v41 = vadd.f32 %v1997_v2, %v4474_v12 }
 0x6aa   : > { %v3587_v11 = vpop.eup %3586  ;;  %v2022_v40 = vadd.f32 %v1992_v55, %v4478_v62  ;;  %v3044_v8 = vpop.f32.mrb[62].mxu0 }
 0x6ab   : > { %v3589_v50 = vpop.eup %3588  ;;  %v2007_v42 = vadd.f32 %v3044_v8, %v4632_v56  ;;  %v2001_v13 = vpop.f32.mrb[63].mxu0  ;;  %3086 = vmatprep.mubr.f32.mxu1 %v3587_v11 }
 0x6ac   : > { %3598 = vtanh.f32 %v2022_v40  ;;  %v2002_v19 = vadd.f32 %v4632_v56, %v2001_v13  ;;  %3087 = vmatmul.mubr.f32.vlgmr.msra.gmra.mrb[48].mxu1 %v3589_v50 }
 0x6ad   : > { %3600 = vtanh.f32 %v2023_v41  ;;  %v2025_v52 = vadd.f32 %v2007_v42, %v4488_v28  ;;  %v4669_v28 = vld [vmem:[%s4774_s9] ss:$0 sm:$0xff] }
 0x6ae   : > { %v3591_v10 = vpop.eup %3590  ;;  %v2024_v59 = vadd.f32 %v2002_v19, %v4492_v14 }
 0x6af   : > { %v3593_v12 = vpop.eup %3592  ;;  %3089 = vmatprep.mubr.f32.mxu1 %v3591_v10 }
 0x6b0   : > { %3602 = vtanh.f32 %v2024_v59  ;;  %3090 = vmatmul.mubr.f32.gmra.mrb[50].mxu1 %v3593_v12 }
 0x6b1   : > { %3604 = vtanh.f32 %v2025_v52 }
 0x6b2   : > { %v3595_v62 = vpop.eup %3594 }
 0x6b3   : > { %v3597_v25 = vpop.eup %3596  ;;  %3092 = vmatprep.mubr.f32.mxu1 %v3595_v62 }
 0x6b4   : > { %3093 = vmatmul.mubr.f32.gmra.mrb[52].mxu1 %v3597_v25 }
 0x6b6   : > { %v3599_v3 = vpop.eup %3598 }
 0x6b7   : > { %v3601_v21 = vpop.eup %3600  ;;  %3095 = vmatprep.mubr.f32.mxu1 %v3599_v3 }
 0x6b8   : > { %3096 = vmatmul.mubr.f32.gmra.mrb[54].mxu1 %v3601_v21 }
 0x6ba   : > { %v3603_v56 = vpop.eup %3602 }
 0x6bb   : > { %v3605_v23 = vpop.eup %3604  ;;  %3098 = vmatprep.mubr.f32.mxu1 %v3603_v56 }
 0x6bc   : > { %3099 = vmatmul.mubr.f32.gmra.mrb[56].mxu1 %v3605_v23 }
 0x773   : > { %v3079_v14 = vpop.f32.mrb[64].mxu0 }
 0x774   : > { %v2137_v9 = vadd.f32 %v3079_v14, %v4669_v28  ;;  %v2131_v15 = vpop.f32.mrb[65].mxu0 }
 0x775   : > { %v2132_v57 = vadd.f32 %v4669_v28, %v2131_v15 }
 0x776   : > { %v2213_v49 = vmul.f32 %v4671_v7, %v2137_v9 }
 0x777   : > { %v2212_v30 = vmul.f32 %v4671_v7, %v2132_v57  ;;  %v3082_v27 = vpop.f32.mrb[66].mxu0 }
 0x778   : > { %v2231_v29 = vadd.f32 %v4674_v17, %v2213_v49  ;;  %v2147_v34 = vadd.f32 %v3082_v27, %v4669_v28  ;;  %v2141_v33 = vpop.f32.mrb[67].mxu0 }
 0x779   : > { %v2230_v38 = vadd.f32 %v4674_v17, %v2212_v30  ;;  %v2142_v22 = vadd.f32 %v4669_v28, %v2141_v33 }
 0x77a   : > { %2248 = vst.msk [vmem:[%s4683_s18 + $0x8] sm:$0xff] %vm2246_vm1, %v2231_v29  ;;  %v2215_v45 = vmul.f32 %v4671_v7, %v2147_v34 }
 0x77b   : > { %2247 = vst.msk [vmem:[%s4683_s18] sm:$0xff] %vm2246_vm1, %v2230_v38  ;;  %v2214_v53 = vmul.f32 %v4671_v7, %v2142_v22  ;;  %v3085_v43 = vpop.f32.mrb[68].mxu0 }
 0x77c   : > { %v2233_v63 = vadd.f32 %v4674_v17, %v2215_v45  ;;  %v2157_v16 = vadd.f32 %v3085_v43, %v4669_v28  ;;  %v2151_v47 = vpop.f32.mrb[69].mxu0 }
 0x77d   : > { %v2232_v20 = vadd.f32 %v4674_v17, %v2214_v53  ;;  %v2152_v60 = vadd.f32 %v4669_v28, %v2151_v47 }
 0x77e   : > { %2250 = vst.msk [vmem:[%s4683_s18 + $0x18] sm:$0xff] %vm2246_vm1, %v2233_v63  ;;  %v2217_v26 = vmul.f32 %v4671_v7, %v2157_v16 }
 0x77f   : > { %2249 = vst.msk [vmem:[%s4683_s18 + $0x10] sm:$0xff] %vm2246_vm1, %v2232_v20  ;;  %v2216_v37 = vmul.f32 %v4671_v7, %v2152_v60  ;;  %v3088_v46 = vpop.f32.mrb[48].mxu1 }
 0x780   : > { %v2235_v39 = vadd.f32 %v4674_v17, %v2217_v26  ;;  %v2167_v44 = vadd.f32 %v3088_v46, %v4669_v28  ;;  %v2161_v24 = vpop.f32.mrb[49].mxu1 }
 0x781   : > { %v2234_v4 = vadd.f32 %v4674_v17, %v2216_v37  ;;  %v2162_v48 = vadd.f32 %v4669_v28, %v2161_v24 }
 0x782   : > { %2252 = vst.msk [vmem:[%s4683_s18 + $0x28] sm:$0xff] %vm2246_vm1, %v2235_v39  ;;  %v2219_v31 = vmul.f32 %v4671_v7, %v2167_v44 }
 0x783   : > { %2251 = vst.msk [vmem:[%s4683_s18 + $0x20] sm:$0xff] %vm2246_vm1, %v2234_v4  ;;  %v2218_v6 = vmul.f32 %v4671_v7, %v2162_v48  ;;  %v3091_v58 = vpop.f32.mrb[50].mxu1 }
 0x784   : > { %v2237_v32 = vadd.f32 %v4674_v17, %v2219_v31  ;;  %v2177_v18 = vadd.f32 %v3091_v58, %v4669_v28  ;;  %v2171_v35 = vpop.f32.mrb[51].mxu1 }
 0x785   : > { %v2236_v61 = vadd.f32 %v4674_v17, %v2218_v6  ;;  %v2172_v36 = vadd.f32 %v4669_v28, %v2171_v35 }
 0x786   : > { %2254 = vst.msk [vmem:[%s4683_s18 + $0x38] sm:$0xff] %vm2246_vm1, %v2237_v32  ;;  %v2221_v51 = vmul.f32 %v4671_v7, %v2177_v18 }
 0x787   : > { %2253 = vst.msk [vmem:[%s4683_s18 + $0x30] sm:$0xff] %vm2246_vm1, %v2236_v61  ;;  %v2220_v1 = vmul.f32 %v4671_v7, %v2172_v36  ;;  %v3094_v0 = vpop.f32.mrb[52].mxu1 }
 0x788   : > { %v2239_v5 = vadd.f32 %v4674_v17, %v2221_v51  ;;  %v2187_v2 = vadd.f32 %v3094_v0, %v4669_v28  ;;  %v2181_v54 = vpop.f32.mrb[53].mxu1 }
 0x789   : > { %v2238_v55 = vadd.f32 %v4674_v17, %v2220_v1  ;;  %v2182_v41 = vadd.f32 %v4669_v28, %v2181_v54 }
 0x78a   : > { %2256 = vst.msk [vmem:[%s4683_s18 + $0x48] sm:$0xff] %vm2246_vm1, %v2239_v5  ;;  %v2223_v11 = vmul.f32 %v4671_v7, %v2187_v2 }
 0x78b   : > { %2255 = vst.msk [vmem:[%s4683_s18 + $0x40] sm:$0xff] %vm2246_vm1, %v2238_v55  ;;  %v2222_v40 = vmul.f32 %v4671_v7, %v2182_v41  ;;  %v3097_v8 = vpop.f32.mrb[54].mxu1 }
 0x78c   : > { %v2241_v50 = vadd.f32 %v4674_v17, %v2223_v11  ;;  %v2197_v42 = vadd.f32 %v3097_v8, %v4669_v28  ;;  %v2191_v13 = vpop.f32.mrb[55].mxu1 }
 0x78d   : > { %v2240_v19 = vadd.f32 %v4674_v17, %v2222_v40  ;;  %v2192_v52 = vadd.f32 %v4669_v28, %v2191_v13 }
 0x78e   : > { %2258 = vst.msk [vmem:[%s4683_s18 + $0x58] sm:$0xff] %vm2246_vm1, %v2241_v50  ;;  %v2225_v10 = vmul.f32 %v4671_v7, %v2197_v42 }
 0x78f   : > { %2257 = vst.msk [vmem:[%s4683_s18 + $0x50] sm:$0xff] %vm2246_vm1, %v2240_v19  ;;  %v2224_v59 = vmul.f32 %v4671_v7, %v2192_v52  ;;  %v3100_v12 = vpop.f32.mrb[56].mxu1 }
 0x790   : > { %v2243_v62 = vadd.f32 %v4674_v17, %v2225_v10  ;;  %v2207_v25 = vadd.f32 %v3100_v12, %v4669_v28  ;;  %v2201_v3 = vpop.f32.mrb[57].mxu1 }
 0x791   : > { %v2242_v21 = vadd.f32 %v4674_v17, %v2224_v59  ;;  %v2202_v56 = vadd.f32 %v4669_v28, %v2201_v3 }
 0x792   : > { %2260 = vst.msk [vmem:[%s4683_s18 + $0x68] sm:$0xff] %vm2246_vm1, %v2243_v62  ;;  %v2227_v23 = vmul.f32 %v4671_v7, %v2207_v25 }
 0x793   : > { %2259 = vst.msk [vmem:[%s4683_s18 + $0x60] sm:$0xff] %vm2246_vm1, %v2242_v21  ;;  %v2226_v14 = vmul.f32 %v4671_v7, %v2202_v56 }
 0x794   : > { %v2245_v9 = vadd.f32 %v4674_v17, %v2227_v23 }
 0x795   : > { %v2244_v15 = vadd.f32 %v4674_v17, %v2226_v14 }
 0x796   : > { %2262 = vst.msk [vmem:[%s4683_s18 + $0x78] sm:$0xff] %vm2246_vm1, %v2245_v9 }
 0x797   : > { %2261 = vst.msk [vmem:[%s4683_s18 + $0x70] sm:$0xff] %vm2246_vm1, %v2244_v15 }
 0x798 PF: > { %s24_s17 = sadd.s32 1, %s3682_s17  }
 0x799   : > { %p21_p3 = scmp.ge.s32.totalorder %s24_s17, 4  }
 0x79b   :  { %23 = sbr.rel (!%p21_p3) target bundleno = 3 (0x3), region = 116 }
 0x7a2   :  { %2285 = vsyncpa [#allocation3], 1 }
 0x7a3   :  { %2287 = vsyncpa [#allocation3 + $0x1], 1 }
 0x7a4   :  { %2288 = vsyncpa [#allocation4], 1 }
 0x7a5   :  { %2290 = vsyncpa [#allocation4 + $0x1], 1 }
 0x7a6   :  { %2291 = vsyncpa [#allocation7], 1 }

</bundles_post_ra>
